<compile_context>
chip_gen: v6e
topology: v6e:2x2x1
jax: 0.10.0
libtpu: 0.0.40
codegen_flags: <defaults>
</compile_context>

<pallas_src>
import jax
import jax.numpy as jnp
from jax.experimental import pallas as pl
from jax.experimental.pallas import tpu as pltpu

LAYER_DIMS = [(28 * 28, 512), (512, 256), (256, 128), (128, 64), (64, 10)]
OUT_PAD = 128      # lane-dense logits slab; real logits live in columns 0..9
MAX_TILE_B = 256   # batch tile: fills the MXU M dimension, amortizes grid overhead


def mlp_kernel(x_ref,
               w1_ref, b1_ref,
               w2_ref, b2_ref,
               w3_ref, b3_ref,
               w4_ref, b4_ref,
               w5_ref, b5_ref,
               out_ref):
    """Fused 5-layer MLP for one batch tile.

    bf16 matmuls on the MXU with f32 accumulation; bias-add + ReLU in f32,
    activations re-cast to bf16 before each subsequent matmul.
    """
    h = x_ref[...]  # (tile_b, 784) bf16

    h = jnp.dot(h, w1_ref[...], preferred_element_type=jnp.float32) + b1_ref[...]
    h = jnp.maximum(h, 0.0).astype(jnp.bfloat16)

    h = jnp.dot(h, w2_ref[...], preferred_element_type=jnp.float32) + b2_ref[...]
    h = jnp.maximum(h, 0.0).astype(jnp.bfloat16)

    h = jnp.dot(h, w3_ref[...], preferred_element_type=jnp.float32) + b3_ref[...]
    h = jnp.maximum(h, 0.0).astype(jnp.bfloat16)

    h = jnp.dot(h, w4_ref[...], preferred_element_type=jnp.float32) + b4_ref[...]
    h = jnp.maximum(h, 0.0).astype(jnp.bfloat16)

    # Final layer: weights/bias zero-padded to 128 output lanes -> unmasked vst.
    logits = jnp.dot(h, w5_ref[...], preferred_element_type=jnp.float32) + b5_ref[...]
    out_ref[...] = logits.astype(out_ref.dtype)


def _round_up(n, m):
    return -(-n // m) * m


def init_params(key):
    """Deterministic init matching torch.nn.Linear (weights stored transposed).

    torch.nn.Linear(in, out): weight (out, in), bias (out,), U(-1/sqrt(in), 1/sqrt(in)).
    We store W as (in, out) so the kernel computes y = x @ W + b.
    """
    params = []
    for (fan_in, fan_out) in LAYER_DIMS:
        key, kw, kb = jax.random.split(key, 3)
        bound = 1.0 / (fan_in ** 0.5)
        w = jax.random.uniform(kw, (fan_in, fan_out), jnp.float32, -bound, bound)
        b = jax.random.uniform(kb, (1, fan_out), jnp.float32, -bound, bound)
        params.append((w, b))
    return params


def neural_network_forward(x_nchw, params):
    """x_nchw: (B, 1, 28, 28) float32 -> logits (B, 10) float32."""
    batch = x_nchw.shape[0]
    # nn.Flatten(): flatten all dims after batch (pure glue, done in plain JAX).
    x2d = x_nchw.reshape(batch, -1)
    assert x2d.shape[1] == 28 * 28

    # Batch tiling: pad batch to a multiple of the tile (sublane multiple of 8).
    padded_b = _round_up(max(batch, 8), 8)
    tile_b = min(MAX_TILE_B, padded_b)
    padded_b = _round_up(padded_b, tile_b)
    n_tiles = padded_b // tile_b

    x_pad = jnp.zeros((padded_b, 28 * 28), jnp.bfloat16).at[:batch].set(
        x2d.astype(jnp.bfloat16))

    # bf16 weights (halved HBM weight traffic, bf16-native MXU), f32 biases.
    flat_args = [x_pad]
    kernel_params = []
    for li, (w, b) in enumerate(params):
        w_k = w.astype(jnp.bfloat16)
        b_k = b.astype(jnp.float32)
        if li == len(params) - 1:
            # Zero-pad the final layer to 128 output lanes (lane-dense store).
            w_k = jnp.zeros((w.shape[0], OUT_PAD), jnp.bfloat16).at[:, :w.shape[1]].set(w_k)
            b_k = jnp.zeros((1, OUT_PAD), jnp.float32).at[:, :b.shape[1]].set(b_k)
        kernel_params.append((w_k, b_k))
        flat_args.extend([w_k, b_k])

    # BlockSpecs: x / out tiled over batch; weights & biases use constant
    # index_maps so they are DMA'd once and stay VMEM-resident across tiles.
    in_specs = [pl.BlockSpec((tile_b, 28 * 28), lambda i: (i, 0))]
    for (w_k, b_k) in kernel_params:
        in_specs.append(pl.BlockSpec(w_k.shape, lambda i: (0, 0)))
        in_specs.append(pl.BlockSpec(b_k.shape, lambda i: (0, 0)))
    out_spec = pl.BlockSpec((tile_b, OUT_PAD), lambda i: (i, 0))

    weight_bytes = sum(w.size * w.dtype.itemsize + b.size * b.dtype.itemsize
                       for (w, b) in kernel_params)
    flops = 2 * padded_b * sum(fi * fo for (fi, fo) in LAYER_DIMS)
    cost = pl.CostEstimate(
        flops=flops,
        transcendentals=0,
        bytes_accessed=weight_bytes + padded_b * 28 * 28 * 2 + padded_b * OUT_PAD * 4)

    out = pl.pallas_call(
        mlp_kernel,
        out_shape=jax.ShapeDtypeStruct((padded_b, OUT_PAD), jnp.float32),
        grid=(n_tiles,),
        in_specs=in_specs,
        out_specs=out_spec,
        compiler_params=pltpu.CompilerParams(
            # v7x: shard batch tiles across its 2 TensorCores; no-op on v5e/v6e.
            dimension_semantics=("parallel",),
            # Explicit budget: tile_b=256 live set is only a few MB, safe on
            # v5e (16 MiB default) / v6e / v7x (32 MiB scoped, 64 MiB physical).
            vmem_limit_bytes=32 * 1024 * 1024),
        cost_estimate=cost,
    )(*flat_args)

    return out[:batch, :LAYER_DIMS[-1][1]]


if __name__ == "__main__":
    key = jax.random.PRNGKey(0)
    key, kx = jax.random.split(key)

    # Small deterministic input consistent with the module: B=2 MNIST-like images.
    x = jax.random.normal(kx, (2, 1, 28, 28), dtype=jnp.float32)
    params = init_params(key)

    logits = neural_network_forward(x, params)
    jax.block_until_ready(logits)

    # Sanity check against a plain-JAX reference using the same bf16-weight /
    # f32-accumulate numerics as the kernel.
    ref = x.reshape(x.shape[0], -1).astype(jnp.bfloat16)
    for i, (w, b) in enumerate(params):
        ref = jnp.dot(ref, w.astype(jnp.bfloat16),
                      preferred_element_type=jnp.float32) + b
        if i < len(params) - 1:
            ref = jnp.maximum(ref, 0.0).astype(jnp.bfloat16)
    assert logits.shape == (2, 10)
    assert jnp.allclose(logits, ref, atol=1e-2, rtol=1e-2), \
        float(jnp.max(jnp.abs(logits - ref)))

    print("KERNEL_OK")
</pallas_src>

<mosaic_0001>
module attributes {stable_mosaic.version = 11 : i64} {
  func.func @mlp_kernel(%arg0: i32, %arg1: memref<8x784xbf16, #tpu.memory_space<vmem>>, %arg2: memref<784x512xbf16, #tpu.memory_space<vmem>>, %arg3: memref<1x512xf32, #tpu.memory_space<vmem>>, %arg4: memref<512x256xbf16, #tpu.memory_space<vmem>>, %arg5: memref<1x256xf32, #tpu.memory_space<vmem>>, %arg6: memref<256x128xbf16, #tpu.memory_space<vmem>>, %arg7: memref<1x128xf32, #tpu.memory_space<vmem>>, %arg8: memref<128x64xbf16, #tpu.memory_space<vmem>>, %arg9: memref<1x64xf32, #tpu.memory_space<vmem>>, %arg10: memref<64x128xbf16, #tpu.memory_space<vmem>>, %arg11: memref<1x128xf32, #tpu.memory_space<vmem>>, %arg12: memref<8x128xf32, #tpu.memory_space<vmem>>) attributes {dimension_semantics = [#tpu.dimension_semantics<parallel>], iteration_bounds = array<i64: 1>, scalar_prefetch = 0 : i64, scratch_operands = 0 : i64, tpu.core_type = #tpu.core_type<tc>, window_params = [{transform_indices = @transform_0, window_bounds = array<i64: 8, 784>}, {pipeline_mode = #tpu.pipeline_mode<synchronous>, transform_indices = @transform_1, window_bounds = array<i64: 784, 512>}, {pipeline_mode = #tpu.pipeline_mode<synchronous>, transform_indices = @transform_2, window_bounds = array<i64: 1, 512>}, {pipeline_mode = #tpu.pipeline_mode<synchronous>, transform_indices = @transform_3, window_bounds = array<i64: 512, 256>}, {pipeline_mode = #tpu.pipeline_mode<synchronous>, transform_indices = @transform_4, window_bounds = array<i64: 1, 256>}, {pipeline_mode = #tpu.pipeline_mode<synchronous>, transform_indices = @transform_5, window_bounds = array<i64: 256, 128>}, {pipeline_mode = #tpu.pipeline_mode<synchronous>, transform_indices = @transform_6, window_bounds = array<i64: 1, 128>}, {pipeline_mode = #tpu.pipeline_mode<synchronous>, transform_indices = @transform_7, window_bounds = array<i64: 128, 64>}, {pipeline_mode = #tpu.pipeline_mode<synchronous>, transform_indices = @transform_8, window_bounds = array<i64: 1, 64>}, {pipeline_mode = #tpu.pipeline_mode<synchronous>, transform_indices = @transform_9, window_bounds = array<i64: 64, 128>}, {pipeline_mode = #tpu.pipeline_mode<synchronous>, transform_indices = @transform_10, window_bounds = array<i64: 1, 128>}, {transform_indices = @transform_11, window_bounds = array<i64: 8, 128>}]} {
    %c0 = arith.constant 0 : index
    %c0_0 = arith.constant 0 : index
    %0 = vector.load %arg1[%c0, %c0_0] : memref<8x784xbf16, #tpu.memory_space<vmem>>, vector<8x784xbf16>
    %c0_1 = arith.constant 0 : index
    %c0_2 = arith.constant 0 : index
    %1 = vector.load %arg2[%c0_1, %c0_2] : memref<784x512xbf16, #tpu.memory_space<vmem>>, vector<784x512xbf16>
    %cst = arith.constant dense<0.000000e+00> : vector<8x512xf32>
    %2 = tpu.matmul %0, %1, %cst {dimension_numbers = #tpu.dot_dimension_numbers<[1], [0], [0], [1], [0, 0, 1, 1], [], []>} : vector<8x784xbf16>, vector<784x512xbf16>, vector<8x512xf32> -> vector<8x512xf32>
    %c0_3 = arith.constant 0 : index
    %c0_4 = arith.constant 0 : index
    %3 = vector.load %arg3[%c0_3, %c0_4] : memref<1x512xf32, #tpu.memory_space<vmem>>, vector<1x512xf32>
    %4 = vector.broadcast %3 : vector<1x512xf32> to vector<8x512xf32>
    %5 = arith.addf %2, %4 : vector<8x512xf32>
    %cst_5 = arith.constant 0.000000e+00 : f32
    %6 = vector.broadcast %cst_5 : f32 to vector<8x512xf32>
    %7 = arith.maximumf %5, %6 : vector<8x512xf32>
    %8 = arith.truncf %7 : vector<8x512xf32> to vector<8x512xbf16>
    %c0_6 = arith.constant 0 : index
    %c0_7 = arith.constant 0 : index
    %9 = vector.load %arg4[%c0_6, %c0_7] : memref<512x256xbf16, #tpu.memory_space<vmem>>, vector<512x256xbf16>
    %cst_8 = arith.constant dense<0.000000e+00> : vector<8x256xf32>
    %10 = tpu.matmul %8, %9, %cst_8 {dimension_numbers = #tpu.dot_dimension_numbers<[1], [0], [0], [1], [0, 0, 1, 1], [], []>} : vector<8x512xbf16>, vector<512x256xbf16>, vector<8x256xf32> -> vector<8x256xf32>
    %c0_9 = arith.constant 0 : index
    %c0_10 = arith.constant 0 : index
    %11 = vector.load %arg5[%c0_9, %c0_10] : memref<1x256xf32, #tpu.memory_space<vmem>>, vector<1x256xf32>
    %12 = vector.broadcast %11 : vector<1x256xf32> to vector<8x256xf32>
    %13 = arith.addf %10, %12 : vector<8x256xf32>
    %cst_11 = arith.constant 0.000000e+00 : f32
    %14 = vector.broadcast %cst_11 : f32 to vector<8x256xf32>
    %15 = arith.maximumf %13, %14 : vector<8x256xf32>
    %16 = arith.truncf %15 : vector<8x256xf32> to vector<8x256xbf16>
    %c0_12 = arith.constant 0 : index
    %c0_13 = arith.constant 0 : index
    %17 = vector.load %arg6[%c0_12, %c0_13] : memref<256x128xbf16, #tpu.memory_space<vmem>>, vector<256x128xbf16>
    %cst_14 = arith.constant dense<0.000000e+00> : vector<8x128xf32>
    %18 = tpu.matmul %16, %17, %cst_14 {dimension_numbers = #tpu.dot_dimension_numbers<[1], [0], [0], [1], [0, 0, 1, 1], [], []>} : vector<8x256xbf16>, vector<256x128xbf16>, vector<8x128xf32> -> vector<8x128xf32>
    %c0_15 = arith.constant 0 : index
    %c0_16 = arith.constant 0 : index
    %19 = vector.load %arg7[%c0_15, %c0_16] : memref<1x128xf32, #tpu.memory_space<vmem>>, vector<1x128xf32>
    %20 = vector.broadcast %19 : vector<1x128xf32> to vector<8x128xf32>
    %21 = arith.addf %18, %20 : vector<8x128xf32>
    %cst_17 = arith.constant 0.000000e+00 : f32
    %22 = vector.broadcast %cst_17 : f32 to vector<8x128xf32>
    %23 = arith.maximumf %21, %22 : vector<8x128xf32>
    %24 = arith.truncf %23 : vector<8x128xf32> to vector<8x128xbf16>
    %c0_18 = arith.constant 0 : index
    %c0_19 = arith.constant 0 : index
    %25 = vector.load %arg8[%c0_18, %c0_19] : memref<128x64xbf16, #tpu.memory_space<vmem>>, vector<128x64xbf16>
    %cst_20 = arith.constant dense<0.000000e+00> : vector<8x64xf32>
    %26 = tpu.matmul %24, %25, %cst_20 {dimension_numbers = #tpu.dot_dimension_numbers<[1], [0], [0], [1], [0, 0, 1, 1], [], []>} : vector<8x128xbf16>, vector<128x64xbf16>, vector<8x64xf32> -> vector<8x64xf32>
    %c0_21 = arith.constant 0 : index
    %c0_22 = arith.constant 0 : index
    %27 = vector.load %arg9[%c0_21, %c0_22] : memref<1x64xf32, #tpu.memory_space<vmem>>, vector<1x64xf32>
    %28 = vector.broadcast %27 : vector<1x64xf32> to vector<8x64xf32>
    %29 = arith.addf %26, %28 : vector<8x64xf32>
    %cst_23 = arith.constant 0.000000e+00 : f32
    %30 = vector.broadcast %cst_23 : f32 to vector<8x64xf32>
    %31 = arith.maximumf %29, %30 : vector<8x64xf32>
    %32 = arith.truncf %31 : vector<8x64xf32> to vector<8x64xbf16>
    %c0_24 = arith.constant 0 : index
    %c0_25 = arith.constant 0 : index
    %33 = vector.load %arg10[%c0_24, %c0_25] : memref<64x128xbf16, #tpu.memory_space<vmem>>, vector<64x128xbf16>
    %cst_26 = arith.constant dense<0.000000e+00> : vector<8x128xf32>
    %34 = tpu.matmul %32, %33, %cst_26 {dimension_numbers = #tpu.dot_dimension_numbers<[1], [0], [0], [1], [0, 0, 1, 1], [], []>} : vector<8x64xbf16>, vector<64x128xbf16>, vector<8x128xf32> -> vector<8x128xf32>
    %c0_27 = arith.constant 0 : index
    %c0_28 = arith.constant 0 : index
    %35 = vector.load %arg11[%c0_27, %c0_28] : memref<1x128xf32, #tpu.memory_space<vmem>>, vector<1x128xf32>
    %36 = vector.broadcast %35 : vector<1x128xf32> to vector<8x128xf32>
    %37 = arith.addf %34, %36 : vector<8x128xf32>
    %c0_29 = arith.constant 0 : index
    %c0_30 = arith.constant 0 : index
    %38 = vector.load %arg12[%c0_29, %c0_30] : memref<8x128xf32, #tpu.memory_space<vmem>>, vector<8x128xf32>
    tpu.vector_store %arg12[%c0_29, %c0_30], %37 {strides = array<i32>} : memref<8x128xf32, #tpu.memory_space<vmem>>, vector<8x128xf32>,
    return
  }
  func.func @transform_0(%arg0: i32) -> (i32, i32) {
    %c0_i32 = arith.constant 0 : i32
    %c0_i32_0 = arith.constant 0 : i32
    return %arg0, %c0_i32 : i32, i32
  }
  func.func @transform_1(%arg0: i32) -> (i32, i32) {
    %c0_i32 = arith.constant 0 : i32
    %c0_i32_0 = arith.constant 0 : i32
    %c0_i32_1 = arith.constant 0 : i32
    return %c0_i32, %c0_i32_0 : i32, i32
  }
  func.func @transform_2(%arg0: i32) -> (i32, i32) {
    %c0_i32 = arith.constant 0 : i32
    %c0_i32_0 = arith.constant 0 : i32
    %c0_i32_1 = arith.constant 0 : i32
    return %c0_i32, %c0_i32_0 : i32, i32
  }
  func.func @transform_3(%arg0: i32) -> (i32, i32) {
    %c0_i32 = arith.constant 0 : i32
    %c0_i32_0 = arith.constant 0 : i32
    %c0_i32_1 = arith.constant 0 : i32
    return %c0_i32, %c0_i32_0 : i32, i32
  }
  func.func @transform_4(%arg0: i32) -> (i32, i32) {
    %c0_i32 = arith.constant 0 : i32
    %c0_i32_0 = arith.constant 0 : i32
    %c0_i32_1 = arith.constant 0 : i32
    return %c0_i32, %c0_i32_0 : i32, i32
  }
  func.func @transform_5(%arg0: i32) -> (i32, i32) {
    %c0_i32 = arith.constant 0 : i32
    %c0_i32_0 = arith.constant 0 : i32
    %c0_i32_1 = arith.constant 0 : i32
    return %c0_i32, %c0_i32_0 : i32, i32
  }
  func.func @transform_6(%arg0: i32) -> (i32, i32) {
    %c0_i32 = arith.constant 0 : i32
    %c0_i32_0 = arith.constant 0 : i32
    %c0_i32_1 = arith.constant 0 : i32
    return %c0_i32, %c0_i32_0 : i32, i32
  }
  func.func @transform_7(%arg0: i32) -> (i32, i32) {
    %c0_i32 = arith.constant 0 : i32
    %c0_i32_0 = arith.constant 0 : i32
    %c0_i32_1 = arith.constant 0 : i32
    return %c0_i32, %c0_i32_0 : i32, i32
  }
  func.func @transform_8(%arg0: i32) -> (i32, i32) {
    %c0_i32 = arith.constant 0 : i32
    %c0_i32_0 = arith.constant 0 : i32
    %c0_i32_1 = arith.constant 0 : i32
    return %c0_i32, %c0_i32_0 : i32, i32
  }
  func.func @transform_9(%arg0: i32) -> (i32, i32) {
    %c0_i32 = arith.constant 0 : i32
    %c0_i32_0 = arith.constant 0 : i32
    %c0_i32_1 = arith.constant 0 : i32
    return %c0_i32, %c0_i32_0 : i32, i32
  }
  func.func @transform_10(%arg0: i32) -> (i32, i32) {
    %c0_i32 = arith.constant 0 : i32
    %c0_i32_0 = arith.constant 0 : i32
    %c0_i32_1 = arith.constant 0 : i32
    return %c0_i32, %c0_i32_0 : i32, i32
  }
  func.func @transform_11(%arg0: i32) -> (i32, i32) {
    %c0_i32 = arith.constant 0 : i32
    %c0_i32_0 = arith.constant 0 : i32
    return %arg0, %c0_i32 : i32, i32
  }
}

</mosaic_0001>

<bundles_post_ra>
// kernel: tpu_custom_call.1
= control target key start
LH: loop header
LB: loop body
LE: loop exit
PB: predicated region body
PF: predicated region fallthrough
CT: control target
= control target key end

     0   :  { %16 = vsyncpa [#allocation3], 0  ;;  %s3626_s0 = inlined_call_operand.vmem [shape: bf16[8,784], index: 0, kind: input, shape index: {}]   ;;  %s3627_s1 = inlined_call_operand.hbm [shape: bf16[784,512], index: 1, kind: input, shape index: {}]   ;;  %s3628_s2 = inlined_call_operand.vmem [shape: f32[1,512], index: 2, kind: input, shape index: {}]   ;;  %s3629_s3 = inlined_call_operand.hbm [shape: bf16[512,256], index: 3, kind: input, shape index: {}]   ;;  %s3630_s4 = inlined_call_operand.vmem [shape: f32[1,256], index: 4, kind: input, shape index: {}]   ;;  %s3631_s5 = inlined_call_operand.hbm [shape: bf16[256,128], index: 5, kind: input, shape index: {}]   ;;  %s3632_s6 = inlined_call_operand.vmem [shape: f32[1,128], index: 6, kind: input, shape index: {}]   ;;  %s3633_s7 = inlined_call_operand.vmem [shape: bf16[128,64], index: 7, kind: input, shape index: {}]   ;;  %s3634_s8 = inlined_call_operand.vmem [shape: f32[1,64], index: 8, kind: input, shape index: {}]   ;;  %s3635_s9 = inlined_call_operand.vmem [shape: bf16[64,128], index: 9, kind: input, shape index: {}]   ;;  %s3636_s10 = inlined_call_operand.vmem [shape: f32[1,128], index: 10, kind: input, shape index: {}]   ;;  %s3637_s11 = inlined_call_operand.hbm [shape: f32[8,128], index: 11, kind: output, shape index: {}]  }
   0x1   :  { %17 = vsyncpa [#allocation6], 0 }
   0x2   :  { %18 = vsyncpa [#allocation4], 0  ;;  %s3412_s17 = smov [#allocation5]  }
   0x3   :  { %s40_s18 = sshll.u32 %s3412_s17, 4  ;;  %s41_s18 = int_to_ptr.vmem [resolvable:$true] %s40_s18 }
   0x4   :  { %s3334_s19 = scalar_lea.vmem %s41_s18, 8192  ;;  %p3339_p1 = scmp.lt.s32.totalorder %s41_s18, %s41_s18 }
   0x5   :  { %p3335_p0 = scmp.ne.s32.totalorder %s41_s18, %s3334_s19  ;;  %p3340_p2 = scmp.lt.s32.totalorder %s3334_s19, %s3334_s19 }
   0x7   :  { %p3341_p3 = por %p3340_p2, %p3339_p1 }
   0x9   :  { %p3342_p4 = pnand %p3341_p3, %p3335_p0 }
   0xb   :  { %3345 = shalt.err (!%p3342_p4)
}
   0xc   :  { %s3413_s20 = smov 128   ;;  %s3414_s21 = smov 8  }
   0xd   :  { %46 = dma.hbm_to_vmem [thread:$0]  %s3629_s3, 8192, %s41_s18, [#allocation6], %s3413_s20, %s3413_s20, %s3414_s21  }
   0xe   :  { %s3415_s24 = smov [#allocation2]  }
   0xf   :  { %s26_s25 = sshll.u32 %s3415_s24, 4  ;;  %s27_s25 = int_to_ptr.vmem [resolvable:$true] %s26_s25 }
  0x10   :  { %s3354_s26 = scalar_lea.vmem %s27_s25, 25088  ;;  %p3359_p6 = scmp.lt.s32.totalorder %s27_s25, %s27_s25 }
  0x11   :  { %p3355_p5 = scmp.ne.s32.totalorder %s27_s25, %s3354_s26  ;;  %p3360_p7 = scmp.lt.s32.totalorder %s3354_s26, %s3354_s26 }
  0x13   :  { %p3361_p8 = por %p3360_p7, %p3359_p6 }
  0x15   :  { %p3362_p9 = pnand %p3361_p8, %p3355_p5 }
  0x17   :  { %3365 = shalt.err (!%p3362_p9)
}
  0x18   :  { %s3416_s27 = smov 256   ;;  %s3417_s28 = smov 16  }
  0x19   :  { %32 = dma.hbm_to_vmem [thread:$0]  %s3627_s1, 25088, %s27_s25, [#allocation3], %s3416_s27, %s3416_s27, %s3417_s28  }
  0x1a   :  { %s3418_s12 = smov [#allocation7]  }
  0x1b   :  { %s54_s13 = sshll.u32 %s3418_s12, 4  ;;  %s55_s13 = int_to_ptr.vmem [resolvable:$true] %s54_s13 }
  0x1c   :  { %s3374_s3 = scalar_lea.vmem %s55_s13, 2048  ;;  %p3379_p11 = scmp.lt.s32.totalorder %s55_s13, %s55_s13 }
  0x1d   :  { %p3375_p10 = scmp.ne.s32.totalorder %s55_s13, %s3374_s3  ;;  %p3380_p12 = scmp.lt.s32.totalorder %s3374_s3, %s3374_s3 }
  0x1f   :  { %p3381_p13 = por %p3380_p12, %p3379_p11 }
  0x21   :  { %p3382_p0 = pnand %p3381_p13, %p3375_p10 }
  0x23   :  { %3385 = shalt.err (!%p3382_p0)
}
  0x24   :  { %s3419_s14 = smov 64   ;;  %s3420_s15 = smov 4  }
  0x25   :  { %60 = dma.hbm_to_vmem [thread:$0]  %s3631_s5, 2048, %s55_s13, [#allocation6], %s3419_s14, %s3419_s14, %s3420_s15  }
  0x26   :  { %3406 = dma.done.wait [#allocation3], 25088  }
  0x27   :  { %3407 = vsyncadd [#allocation3], 4294942208 }
  0x28   :  { %3408 = dma.done.wait [#allocation6], 10240  }
  0x29   :  { %3409 = vsyncadd [#allocation6], 4294957056  ;;  %v2901_v0 = vld [vmem:[#allocation2 + $0xe4] ss:$16 sps:$4 sm:$0xff]   ;;  %v2905_v2 = vld [vmem:[#allocation2 + $0xe0] ss:$16 sps:$4 sm:$0xff]  }
  0x2a   :  { %v2903_v1 = vld [vmem:[#allocation2 + $0x2e4] ss:$16 sps:$4 sm:$0xff]   ;;  %1311 = vmatprep.subr.bf16.mxu0 %v2901_v0  ;;  %v2906_v3 = vld [vmem:[#allocation2 + $0x2e0] ss:$16 sps:$4 sm:$0xff]   ;;  %v82_v48 = vld [vmem:[%s3626_s0 + $0x8] sm:$0xff]  ;;  %vm1307_vm0 = vcmask 130048  }
  0x2b   :  { %1352 = vmatprep.subr.bf16.mxu1 %v2903_v1  ;;  %v2907_v4 = vld [vmem:[#allocation2 + $0xc4] ss:$16 sps:$4 sm:$0xff]   ;;  %1312 = vmatpush1.bf16.msra.mxu0 %v2905_v2  ;;  %v2911_v6 = vld [vmem:[#allocation2 + $0xc0] ss:$16 sps:$4 sm:$0xff]   ;;  %v3502_v51 = vcombine.high %v82_v48, %v82_v48  ;;  %vm3423_vm1 = vmmov 0   ;;  %vm2458_vm2 = vcmask 523264  }
  0x2c   :  { %1353 = vmatpush1.bf16.msra.mxu1 %v2906_v3  ;;  %v2909_v5 = vld [vmem:[#allocation2 + $0x2c4] ss:$16 sps:$4 sm:$0xff]   ;;  %1313 = vmatprep.subr.bf16.mxu0 %v2907_v4  ;;  %v2912_v7 = vld [vmem:[#allocation2 + $0x2c0] ss:$16 sps:$4 sm:$0xff]   ;;  %s3424_s29 = smov [#allocation8]  }
  0x2d   :  { %1354 = vmatprep.subr.bf16.mxu1 %v2909_v5  ;;  %v2913_v8 = vld [vmem:[#allocation2 + $0xa4] ss:$16 sps:$4 sm:$0xff]   ;;  %v2917_v10 = vld [vmem:[#allocation2 + $0xa0] ss:$16 sps:$4 sm:$0xff]   ;;  %1384 = vmatprep.mubr.bf16.mxu1 %v3502_v51 }
  0x2e   :  { %v2915_v9 = vld [vmem:[#allocation2 + $0x2a4] ss:$16 sps:$4 sm:$0xff]   ;;  %v2918_v11 = vld [vmem:[#allocation2 + $0x2a0] ss:$16 sps:$4 sm:$0xff]  }
  0x2f   :  { %1314 = vmatpush1.bf16.msra.mxu0 %v2911_v6  ;;  %v2919_v12 = vld [vmem:[#allocation2 + $0x84] ss:$16 sps:$4 sm:$0xff]   ;;  %v2923_v14 = vld [vmem:[#allocation2 + $0x80] ss:$16 sps:$4 sm:$0xff]  }
  0x30   :  { %1355 = vmatpush1.bf16.msra.mxu1 %v2912_v7  ;;  %1315 = vmatprep.subr.bf16.mxu0 %v2913_v8  ;;  %v2921_v13 = vld [vmem:[#allocation2 + $0x284] ss:$16 sps:$4 sm:$0xff]   ;;  %v2924_v15 = vld [vmem:[#allocation2 + $0x280] ss:$16 sps:$4 sm:$0xff]   ;;  %v3508_v7 = vcombine.low %v82_v48, %v82_v48  ;;  %v3061_v48 = vld [vmem:[#allocation2 + $0x1ec] ss:$16 sps:$4 sm:$0xff]  }
  0x31   :  { %1356 = vmatprep.subr.bf16.mxu1 %v2915_v9  ;;  %v2925_v16 = vld [vmem:[#allocation2 + $0x64] ss:$16 sps:$4 sm:$0xff]   ;;  %v2929_v18 = vld [vmem:[#allocation2 + $0x60] ss:$16 sps:$4 sm:$0xff]  }
  0x32   :  { %v2927_v17 = vld [vmem:[#allocation2 + $0x264] ss:$16 sps:$4 sm:$0xff]   ;;  %v2930_v19 = vld [vmem:[#allocation2 + $0x260] ss:$16 sps:$4 sm:$0xff]  }
  0x33   :  { %1316 = vmatpush1.bf16.msra.mxu0 %v2917_v10  ;;  %v2931_v20 = vld [vmem:[#allocation2 + $0x44] ss:$16 sps:$4 sm:$0xff]   ;;  %v2935_v22 = vld [vmem:[#allocation2 + $0x40] ss:$16 sps:$4 sm:$0xff]  }
  0x34   :  { %1357 = vmatpush1.bf16.msra.mxu1 %v2918_v11  ;;  %1317 = vmatprep.subr.bf16.mxu0 %v2919_v12  ;;  %v2933_v21 = vld [vmem:[#allocation2 + $0x244] ss:$16 sps:$4 sm:$0xff]   ;;  %v2936_v23 = vld [vmem:[#allocation2 + $0x240] ss:$16 sps:$4 sm:$0xff]   ;;  %v3012_v11 = vld [vmem:[#allocation2 + $0xec] ss:$16 sps:$4 sm:$0xff]  }
  0x35   :  { %1358 = vmatprep.subr.bf16.mxu1 %v2921_v13  ;;  %v2937_v24 = vld [vmem:[#allocation2 + $0x24] ss:$16 sps:$4 sm:$0xff]   ;;  %v2941_v26 = vld [vmem:[#allocation2 + $0x20] ss:$16 sps:$4 sm:$0xff]   ;;  %v3421_v13 = vmov 0  }
  0x36   :  { %v2939_v25 = vld [vmem:[#allocation2 + $0x224] ss:$16 sps:$4 sm:$0xff]   ;;  %v2942_v27 = vld [vmem:[#allocation2 + $0x220] ss:$16 sps:$4 sm:$0xff]  }
  0x37   :  { %1318 = vmatpush1.bf16.msra.mxu0 %v2923_v14  ;;  %v2943_v28 = vld [vmem:[#allocation2 + $0x4] ss:$16 sps:$4 sm:$0xff]   ;;  %v2947_v30 = vld [vmem:[#allocation2] ss:$16 sps:$4 sm:$0xff]  }
  0x38   :  { %1359 = vmatpush1.bf16.msra.mxu1 %v2924_v15  ;;  %1319 = vmatprep.subr.bf16.mxu0 %v2925_v16  ;;  %v2945_v29 = vld [vmem:[#allocation2 + $0x204] ss:$16 sps:$4 sm:$0xff]   ;;  %v2948_v31 = vld [vmem:[#allocation2 + $0x200] ss:$16 sps:$4 sm:$0xff]   ;;  %v3010_v15 = vld [vmem:[#allocation2 + $0xe8] ss:$16 sps:$4 sm:$0xff]  }
  0x39   :  { %1360 = vmatprep.subr.bf16.mxu1 %v2927_v17  ;;  %v2949_v32 = vld [vmem:[#allocation2 + $0x1e4] ss:$16 sps:$4 sm:$0xff]   ;;  %v2953_v34 = vld [vmem:[#allocation2 + $0x1e0] ss:$16 sps:$4 sm:$0xff]   ;;  %v3516_v17 = vld [vmem:[%s3626_s0 + $0x18] ss:$0 sps:$4 sm:$0xff]  }
  0x3a   :  { %v2951_v33 = vld [vmem:[#allocation2 + $0x3e4] ss:$16 sps:$4 sm:$0xff]   ;;  %v2954_v35 = vld [vmem:[#allocation2 + $0x3e0] ss:$16 sps:$4 sm:$0xff]  }
  0x3b   :  { %1320 = vmatpush1.bf16.msra.mxu0 %v2929_v18  ;;  %v2955_v36 = vld [vmem:[#allocation2 + $0x1c4] ss:$16 sps:$4 sm:$0xff]   ;;  %v2959_v38 = vld [vmem:[#allocation2 + $0x1c0] ss:$16 sps:$4 sm:$0xff]   ;;  %v3019_v18 = vld [vmem:[#allocation2 + $0xcc] ss:$16 sps:$4 sm:$0xff]  }
  0x3c   :  { %1361 = vmatpush1.bf16.msra.mxu1 %v2930_v19  ;;  %1321 = vmatprep.subr.bf16.mxu0 %v2931_v20  ;;  %v2957_v37 = vld [vmem:[#allocation2 + $0x3c4] ss:$16 sps:$4 sm:$0xff]   ;;  %v2960_v39 = vld [vmem:[#allocation2 + $0x3c0] ss:$16 sps:$4 sm:$0xff]   ;;  %v3017_v20 = vld [vmem:[#allocation2 + $0xc8] ss:$16 sps:$4 sm:$0xff]  }
  0x3d   :  { %1362 = vmatprep.subr.bf16.mxu1 %v2933_v21  ;;  %v2961_v40 = vld [vmem:[#allocation2 + $0x1a4] ss:$16 sps:$4 sm:$0xff]   ;;  %v2965_v42 = vld [vmem:[#allocation2 + $0x1a0] ss:$16 sps:$4 sm:$0xff]  }
  0x3e   :  { %v2963_v41 = vld [vmem:[#allocation2 + $0x3a4] ss:$16 sps:$4 sm:$0xff]   ;;  %v2966_v43 = vld [vmem:[#allocation2 + $0x3a0] ss:$16 sps:$4 sm:$0xff]  }
  0x3f   :  { %1322 = vmatpush1.bf16.msra.mxu0 %v2935_v22  ;;  %v2967_v44 = vld [vmem:[#allocation2 + $0x184] ss:$16 sps:$4 sm:$0xff]   ;;  %v2971_v49 = vld [vmem:[#allocation2 + $0x180] ss:$16 sps:$4 sm:$0xff]   ;;  %v3025_v22 = vld [vmem:[#allocation2 + $0xac] ss:$16 sps:$4 sm:$0xff]  }
  0x40   :  { %1363 = vmatpush1.bf16.msra.mxu1 %v2936_v23  ;;  %1323 = vmatprep.subr.bf16.mxu0 %v2937_v24  ;;  %v2969_v45 = vld [vmem:[#allocation2 + $0x384] ss:$16 sps:$4 sm:$0xff]   ;;  %v2972_v50 = vld [vmem:[#allocation2 + $0x380] ss:$16 sps:$4 sm:$0xff]   ;;  %v3023_v24 = vld [vmem:[#allocation2 + $0xa8] ss:$16 sps:$4 sm:$0xff]  }
  0x41   :  { %1364 = vmatprep.subr.bf16.mxu1 %v2939_v25  ;;  %v81_v46 = vld [vmem:[%s3626_s0] sm:$0xff] }
  0x42   :  { %v3497_v47 = vcombine.high %v81_v46, %v81_v46  ;;  %v2973_v52 = vld [vmem:[#allocation2 + $0x164] ss:$16 sps:$4 sm:$0xff]   ;;  %v2977_v54 = vld [vmem:[#allocation2 + $0x160] ss:$16 sps:$4 sm:$0xff]   ;;  %v3506_v6 = vcombine.low %v81_v46, %v81_v46  ;;  %v3053_v46 = vld [vmem:[#allocation2 + $0x8] ss:$16 sps:$4 sm:$0xff]  }
  0x43   :  { %1324 = vmatpush1.bf16.msra.mxu0 %v2941_v26  ;;  %v2975_v53 = vld [vmem:[#allocation2 + $0x364] ss:$16 sps:$4 sm:$0xff]   ;;  %v2978_v55 = vld [vmem:[#allocation2 + $0x360] ss:$16 sps:$4 sm:$0xff]   ;;  %v3031_v26 = vld [vmem:[#allocation2 + $0x8c] ss:$16 sps:$4 sm:$0xff]  }
  0x44   :  { %1365 = vmatpush1.bf16.msra.mxu1 %v2942_v27  ;;  %1325 = vmatprep.subr.bf16.mxu0 %v2943_v28  ;;  %v2979_v56 = vld [vmem:[#allocation2 + $0x144] ss:$16 sps:$4 sm:$0xff]   ;;  %v2983_v58 = vld [vmem:[#allocation2 + $0x140] ss:$16 sps:$4 sm:$0xff]   ;;  %v3029_v28 = vld [vmem:[#allocation2 + $0x88] ss:$16 sps:$4 sm:$0xff]  }
  0x45   :  { %1366 = vmatprep.subr.bf16.mxu1 %v2945_v29  ;;  %1343 = vmatprep.mubr.bf16.mxu0 %v3497_v47  ;;  %v2981_v57 = vld [vmem:[#allocation2 + $0x344] ss:$16 sps:$4 sm:$0xff]   ;;  %v2984_v59 = vld [vmem:[#allocation2 + $0x340] ss:$16 sps:$4 sm:$0xff]  }
  0x46   :  { %v2985_v60 = vld [vmem:[#allocation2 + $0x124] ss:$16 sps:$4 sm:$0xff]   ;;  %v2989_v62 = vld [vmem:[#allocation2 + $0x120] ss:$16 sps:$4 sm:$0xff]  }
  0x47   :  { %1326 = vmatpush1.bf16.msra.mxu0 %v2947_v30  ;;  %v2987_v61 = vld [vmem:[#allocation2 + $0x324] ss:$16 sps:$4 sm:$0xff]   ;;  %v2990_v63 = vld [vmem:[#allocation2 + $0x320] ss:$16 sps:$4 sm:$0xff]   ;;  %v3037_v30 = vld [vmem:[#allocation2 + $0x6c] ss:$16 sps:$4 sm:$0xff]  }
  0x48   :  { %1367 = vmatpush1.bf16.msra.mxu1 %v2948_v31  ;;  %1327 = vmatprep.subr.bf16.mxu0 %v2949_v32  ;;  %v2991_v0 = vld [vmem:[#allocation2 + $0x104] ss:$16 sps:$4 sm:$0xff]   ;;  %v2995_v2 = vld [vmem:[#allocation2 + $0x100] ss:$16 sps:$4 sm:$0xff]  }
  0x49   :  { %1368 = vmatprep.subr.bf16.mxu1 %v2951_v33  ;;  %v2993_v1 = vld [vmem:[#allocation2 + $0x304] ss:$16 sps:$4 sm:$0xff]   ;;  %v2996_v3 = vld [vmem:[#allocation2 + $0x300] ss:$16 sps:$4 sm:$0xff]  }
  0x4a   :  { %v3003_v4 = vld [vmem:[#allocation2 + $0x4e4] ss:$16 sps:$4 sm:$0xff]   ;;  %v3001_v8 = vld [vmem:[#allocation2 + $0x4e0] ss:$16 sps:$4 sm:$0xff]  }
  0x4b   :  { %1328 = vmatpush2.bf16.msra.mxu0 %v2953_v34  ;;  %v3006_v5 = vld [vmem:[#allocation2 + $0x604] ss:$16 sps:$4 sm:$0xff]   ;;  %v3004_v9 = vld [vmem:[#allocation2 + $0x600] ss:$16 sps:$4 sm:$0xff]   ;;  %v3035_v34 = vld [vmem:[#allocation2 + $0x68] ss:$16 sps:$4 sm:$0xff]  }
  0x4c   :  { %1369 = vmatpush2.bf16.msra.mxu1 %v2954_v35  ;;  %1329 = vmatprep.subr.bf16.mxu0 %v2955_v36  ;;  %v3009_v10 = vld [vmem:[#allocation2 + $0x4c4] ss:$16 sps:$4 sm:$0xff]   ;;  %v3007_v12 = vld [vmem:[#allocation2 + $0x4c0] ss:$16 sps:$4 sm:$0xff]   ;;  %v3043_v36 = vld [vmem:[#allocation2 + $0x4c] ss:$16 sps:$4 sm:$0xff]  }
  0x4d   :  { %1370 = vmatprep.subr.bf16.mxu1 %v2957_v37  ;;  %v3015_v14 = vld [vmem:[#allocation2 + $0x4a4] ss:$16 sps:$4 sm:$0xff]   ;;  %v3013_v16 = vld [vmem:[#allocation2 + $0x4a0] ss:$16 sps:$4 sm:$0xff]  }
  0x4e   :  { %v3022_v19 = vld [vmem:[#allocation2 + $0x484] ss:$16 sps:$4 sm:$0xff]   ;;  %v3020_v21 = vld [vmem:[#allocation2 + $0x480] ss:$16 sps:$4 sm:$0xff]  }
  0x4f   :  { %1330 = vmatpush2.bf16.msra.mxu0 %v2959_v38  ;;  %v3028_v23 = vld [vmem:[#allocation2 + $0x464] ss:$16 sps:$4 sm:$0xff]   ;;  %v3026_v25 = vld [vmem:[#allocation2 + $0x460] ss:$16 sps:$4 sm:$0xff]   ;;  %v3041_v38 = vld [vmem:[#allocation2 + $0x48] ss:$16 sps:$4 sm:$0xff]  }
  0x50   :  { %1371 = vmatpush2.bf16.msra.mxu1 %v2960_v39  ;;  %1331 = vmatprep.subr.bf16.mxu0 %v2961_v40  ;;  %v3034_v27 = vld [vmem:[#allocation2 + $0x444] ss:$16 sps:$4 sm:$0xff]   ;;  %v3032_v29 = vld [vmem:[#allocation2 + $0x440] ss:$16 sps:$4 sm:$0xff]   ;;  %v3049_v40 = vld [vmem:[#allocation2 + $0x2c] ss:$16 sps:$4 sm:$0xff]  }
  0x51   :  { %1372 = vmatprep.subr.bf16.mxu1 %v2963_v41  ;;  %v3040_v31 = vld [vmem:[#allocation2 + $0x424] ss:$16 sps:$4 sm:$0xff]   ;;  %v3038_v35 = vld [vmem:[#allocation2 + $0x420] ss:$16 sps:$4 sm:$0xff]  }
  0x52   :  { %v3524_v32 = vld [vmem:[%s3626_s0 + $0x10] sm:$0xff] }
  0x53   :  { %1332 = vmatpush2.bf16.msra.mxu0 %v2965_v42  ;;  %v3528_v33 = vcombine.high %v3524_v32, %v3524_v32  ;;  %v3046_v37 = vld [vmem:[#allocation2 + $0x404] ss:$16 sps:$4 sm:$0xff]   ;;  %v3044_v39 = vld [vmem:[#allocation2 + $0x400] ss:$16 sps:$4 sm:$0xff]   ;;  %v3047_v42 = vld [vmem:[#allocation2 + $0x28] ss:$16 sps:$4 sm:$0xff]  }
  0x54   :  { %1373 = vmatpush2.bf16.msra.mxu1 %v2966_v43  ;;  %1333 = vmatprep.subr.bf16.mxu0 %v2967_v44  ;;  %v3052_v41 = vld [vmem:[#allocation2 + $0x5e4] ss:$16 sps:$4 sm:$0xff]   ;;  %v3050_v43 = vld [vmem:[#allocation2 + $0x5e0] ss:$16 sps:$4 sm:$0xff]   ;;  %v3055_v44 = vld [vmem:[#allocation2 + $0xc] ss:$16 sps:$4 sm:$0xff]  }
  0x55   :  { %1374 = vmatprep.subr.bf16.mxu1 %v2969_v45  ;;  %v3058_v45 = vld [vmem:[#allocation2 + $0x5c4] ss:$16 sps:$4 sm:$0xff]  }
  0x57   :  { %1334 = vmatpush2.bf16.msra.mxu0 %v2971_v49  ;;  %v3064_v49 = vld [vmem:[#allocation2 + $0x5a4] ss:$16 sps:$4 sm:$0xff]  }
  0x58   :  { %1375 = vmatpush2.bf16.msra.mxu1 %v2972_v50  ;;  %1335 = vmatprep.subr.bf16.mxu0 %v2973_v52  ;;  %v3059_v50 = vld [vmem:[#allocation2 + $0x1e8] ss:$16 sps:$4 sm:$0xff]   ;;  %v3062_v52 = vld [vmem:[#allocation2 + $0x5a0] ss:$16 sps:$4 sm:$0xff]  }
  0x59   :  { %1376 = vmatprep.subr.bf16.mxu1 %v2975_v53  ;;  %v3067_v53 = vld [vmem:[#allocation2 + $0x1cc] ss:$16 sps:$4 sm:$0xff]  }
  0x5b   :  { %1336 = vmatpush2.bf16.msra.mxu0 %v2977_v54  ;;  %v3070_v54 = vld [vmem:[#allocation2 + $0x584] ss:$16 sps:$4 sm:$0xff]  }
  0x5c   :  { %1377 = vmatpush2.bf16.msra.mxu1 %v2978_v55  ;;  %1337 = vmatprep.subr.bf16.mxu0 %v2979_v56  ;;  %v3065_v55 = vld [vmem:[#allocation2 + $0x1c8] ss:$16 sps:$4 sm:$0xff]   ;;  %v3068_v56 = vld [vmem:[#allocation2 + $0x580] ss:$16 sps:$4 sm:$0xff]  }
  0x5d   :  { %1378 = vmatprep.subr.bf16.mxu1 %v2981_v57  ;;  %v3073_v57 = vld [vmem:[#allocation2 + $0x1ac] ss:$16 sps:$4 sm:$0xff]  }
  0x5f   :  { %1338 = vmatpush2.bf16.msra.mxu0 %v2983_v58  ;;  %v3076_v58 = vld [vmem:[#allocation2 + $0x564] ss:$16 sps:$4 sm:$0xff]  }
  0x60   :  { %1379 = vmatpush2.bf16.msra.mxu1 %v2984_v59  ;;  %1339 = vmatprep.subr.bf16.mxu0 %v2985_v60  ;;  %v3071_v59 = vld [vmem:[#allocation2 + $0x1a8] ss:$16 sps:$4 sm:$0xff]   ;;  %v3074_v60 = vld [vmem:[#allocation2 + $0x560] ss:$16 sps:$4 sm:$0xff]  }
  0x61   :  { %1380 = vmatprep.subr.bf16.mxu1 %v2987_v61  ;;  %v3079_v61 = vld [vmem:[#allocation2 + $0x18c] ss:$16 sps:$4 sm:$0xff]  }
  0x63   :  { %1340 = vmatpush2.bf16.msra.mxu0 %v2989_v62  ;;  %v3082_v62 = vld [vmem:[#allocation2 + $0x544] ss:$16 sps:$4 sm:$0xff]  }
  0x64   :  { %1381 = vmatpush2.bf16.msra.mxu1 %v2990_v63  ;;  %1341 = vmatprep.subr.bf16.mxu0 %v2991_v0  ;;  %v3077_v63 = vld [vmem:[#allocation2 + $0x188] ss:$16 sps:$4 sm:$0xff]   ;;  %v3080_v0 = vld [vmem:[#allocation2 + $0x540] ss:$16 sps:$4 sm:$0xff]  }
  0x65   :  { %1382 = vmatprep.subr.bf16.mxu1 %v2993_v1  ;;  %v3085_v1 = vld [vmem:[#allocation2 + $0x16c] ss:$16 sps:$4 sm:$0xff]  }
  0x67   :  { %1342 = vmatpush2.bf16.msra.mxu0 %v2995_v2  ;;  %v3088_v2 = vld [vmem:[#allocation2 + $0x524] ss:$16 sps:$4 sm:$0xff]  }
  0x68   :  { %1383 = vmatpush2.bf16.msra.mxu1 %v2996_v3  ;;  %1393 = vmatprep.subr.bf16.mxu0 %v3003_v4  ;;  %v3083_v3 = vld [vmem:[#allocation2 + $0x168] ss:$16 sps:$4 sm:$0xff]   ;;  %v3086_v4 = vld [vmem:[#allocation2 + $0x520] ss:$16 sps:$4 sm:$0xff]  }
  0x69   :  { %1448 = vmatprep.subr.bf16.mxu1 %v3006_v5  ;;  %v3091_v5 = vld [vmem:[#allocation2 + $0x14c] ss:$16 sps:$4 sm:$0xff]  }
  0x6a   :  { %1344 = vmatmul.mubr.bf16.vlgmr.msra.gmra.mxu0 %v3506_v6 }
  0x6b   :  { %1385 = vmatmul.mubr.bf16.vlgmr.msra.gmra.mxu1 %v3508_v7  ;;  %1394 = vmatpush1.bf16.msra.mxu0 %v3001_v8  ;;  %v3094_v8 = vld [vmem:[#allocation2 + $0x504] ss:$16 sps:$4 sm:$0xff]  }
  0x6c   :  { %1449 = vmatpush1.bf16.msra.mxu1 %v3004_v9  ;;  %1395 = vmatprep.subr.bf16.mxu0 %v3009_v10  ;;  %v3089_v9 = vld [vmem:[#allocation2 + $0x148] ss:$16 sps:$4 sm:$0xff]   ;;  %v3092_v10 = vld [vmem:[#allocation2 + $0x500] ss:$16 sps:$4 sm:$0xff]  }
  0x6d   :  { %1466 = vmatprep.mubr.bf16.mxu1 %v3421_v13  ;;  %1475 = vmatprep.subr.bf16.mxu1 %v3012_v11  ;;  %v3099_v11 = vld [vmem:[#allocation2 + $0x12c] ss:$16 sps:$4 sm:$0xff]  }
  0x6e   :  { %1425 = vmatprep.mubr.bf16.mxu0 %v3528_v33 }
  0x6f   :  { %1396 = vmatpush1.bf16.msra.mxu0 %v3007_v12  ;;  %v3102_v12 = vld [vmem:[#allocation2 + $0x2ec] ss:$16 sps:$4 sm:$0xff]  }
  0x70   :  { %1397 = vmatprep.subr.bf16.mxu0 %v3015_v14  ;;  %v3533_v14 = vcombine.low %v3524_v32, %v3524_v32  ;;  %v3121_v32 = vld [vmem:[#allocation2 + $0x4a8] ss:$16 sps:$4 sm:$0xff]  }
  0x73   :  { %2722 = vmatmul.mubr.msk.bf16.vlgmr.msra.gmra.mxu1 %vm1307_vm0, %v3516_v17  ;;  %1398 = vmatpush1.bf16.msra.mxu0 %v3013_v16  ;;  %v3100_v16 = vld [vmem:[#allocation2 + $0x2e8] ss:$16 sps:$4 sm:$0xff]  }
  0x74   :  { %1476 = vmatpush1.bf16.msra.mxu1 %v3010_v15  ;;  %1399 = vmatprep.subr.bf16.mxu0 %v3022_v19  ;;  %v3097_v15 = vld [vmem:[#allocation2 + $0x128] ss:$16 sps:$4 sm:$0xff]   ;;  %v3108_v19 = vld [vmem:[#allocation2 + $0x2cc] ss:$16 sps:$4 sm:$0xff]  }
  0x75   :  { %1477 = vmatprep.subr.bf16.mxu1 %v3019_v18  ;;  %1507 = vmatprep.mubr.bf16.mxu1 %v3497_v47  ;;  %v3056_v47 = vld [vmem:[#allocation2 + $0x5c0] ss:$16 sps:$4 sm:$0xff]   ;;  %v3105_v18 = vld [vmem:[#allocation2 + $0x10c] ss:$16 sps:$4 sm:$0xff]  }
  0x77   :  { %1400 = vmatpush1.bf16.msra.mxu0 %v3020_v21  ;;  %v3106_v21 = vld [vmem:[#allocation2 + $0x2c8] ss:$16 sps:$4 sm:$0xff]  }
  0x78   :  { %1478 = vmatpush1.bf16.msra.mxu1 %v3017_v20  ;;  %1401 = vmatprep.subr.bf16.mxu0 %v3028_v23  ;;  %v3103_v20 = vld [vmem:[#allocation2 + $0x108] ss:$16 sps:$4 sm:$0xff]   ;;  %v3114_v23 = vld [vmem:[#allocation2 + $0x2ac] ss:$16 sps:$4 sm:$0xff]  }
  0x79   :  { %1479 = vmatprep.subr.bf16.mxu1 %v3025_v22  ;;  %v3111_v22 = vld [vmem:[#allocation2 + $0x4ec] ss:$16 sps:$4 sm:$0xff]  }
  0x7b   :  { %1402 = vmatpush1.bf16.msra.mxu0 %v3026_v25  ;;  %v3112_v25 = vld [vmem:[#allocation2 + $0x2a8] ss:$16 sps:$4 sm:$0xff]  }
  0x7c   :  { %1480 = vmatpush1.bf16.msra.mxu1 %v3023_v24  ;;  %1403 = vmatprep.subr.bf16.mxu0 %v3034_v27  ;;  %v3109_v24 = vld [vmem:[#allocation2 + $0x4e8] ss:$16 sps:$4 sm:$0xff]   ;;  %v3120_v27 = vld [vmem:[#allocation2 + $0x28c] ss:$16 sps:$4 sm:$0xff]  }
  0x7d   :  { %1481 = vmatprep.subr.bf16.mxu1 %v3031_v26  ;;  %v3117_v26 = vld [vmem:[#allocation2 + $0x4cc] ss:$16 sps:$4 sm:$0xff]  }
  0x7f   :  { %1404 = vmatpush1.bf16.msra.mxu0 %v3032_v29  ;;  %v3118_v29 = vld [vmem:[#allocation2 + $0x288] ss:$16 sps:$4 sm:$0xff]  }
  0x80   :  { %1482 = vmatpush1.bf16.msra.mxu1 %v3029_v28  ;;  %1405 = vmatprep.subr.bf16.mxu0 %v3040_v31  ;;  %v3115_v28 = vld [vmem:[#allocation2 + $0x4c8] ss:$16 sps:$4 sm:$0xff]   ;;  %v3126_v31 = vld [vmem:[#allocation2 + $0x26c] ss:$16 sps:$4 sm:$0xff]  }
  0x81   :  { %1483 = vmatprep.subr.bf16.mxu1 %v3037_v30  ;;  %v3123_v30 = vld [vmem:[#allocation2 + $0x4ac] ss:$16 sps:$4 sm:$0xff]  }
  0x83   :  { %1406 = vmatpush1.bf16.msra.mxu0 %v3038_v35  ;;  %v3132_v35 = vld [vmem:[#allocation2 + $0x24c] ss:$16 sps:$4 sm:$0xff]  }
  0x84   :  { %1484 = vmatpush1.bf16.msra.mxu1 %v3035_v34  ;;  %1407 = vmatprep.subr.bf16.mxu0 %v3046_v37  ;;  %v3129_v34 = vld [vmem:[#allocation2 + $0x48c] ss:$16 sps:$4 sm:$0xff]  }
  0x85   :  { %1485 = vmatprep.subr.bf16.mxu1 %v3043_v36  ;;  %v3127_v36 = vld [vmem:[#allocation2 + $0x488] ss:$16 sps:$4 sm:$0xff]   ;;  %v3135_v37 = vld [vmem:[#allocation2 + $0x46c] ss:$16 sps:$4 sm:$0xff]  }
  0x87   :  { %1408 = vmatpush1.bf16.msra.mxu0 %v3044_v39  ;;  %v3133_v39 = vld [vmem:[#allocation2 + $0x468] ss:$16 sps:$4 sm:$0xff]  }
  0x88   :  { %1486 = vmatpush1.bf16.msra.mxu1 %v3041_v38  ;;  %1409 = vmatprep.subr.bf16.mxu0 %v3052_v41  ;;  %v3138_v38 = vld [vmem:[#allocation2 + $0x22c] ss:$16 sps:$4 sm:$0xff]  }
  0x89   :  { %1487 = vmatprep.subr.bf16.mxu1 %v3049_v40  ;;  %v3136_v40 = vld [vmem:[#allocation2 + $0x228] ss:$16 sps:$4 sm:$0xff]   ;;  %v3144_v41 = vld [vmem:[#allocation2 + $0x20c] ss:$16 sps:$4 sm:$0xff]  }
  0x8b   :  { %1410 = vmatpush2.bf16.msra.mxu0 %v3050_v43  ;;  %v3142_v43 = vld [vmem:[#allocation2 + $0x208] ss:$16 sps:$4 sm:$0xff]  }
  0x8c   :  { %1488 = vmatpush1.bf16.msra.mxu1 %v3047_v42  ;;  %1411 = vmatprep.subr.bf16.mxu0 %v3058_v45  ;;  %v3139_v42 = vld [vmem:[#allocation2 + $0x448] ss:$16 sps:$4 sm:$0xff]   ;;  %v3150_v45 = vld [vmem:[#allocation2 + $0x3ec] ss:$16 sps:$4 sm:$0xff]  }
  0x8d   :  { %1489 = vmatprep.subr.bf16.mxu1 %v3055_v44  ;;  %v3147_v44 = vld [vmem:[#allocation2 + $0x42c] ss:$16 sps:$4 sm:$0xff]  }
  0x8f   :  { %1412 = vmatpush2.bf16.msra.mxu0 %v3056_v47  ;;  %v3148_v47 = vld [vmem:[#allocation2 + $0x3e8] ss:$16 sps:$4 sm:$0xff]  }
  0x90   :  { %1490 = vmatpush1.bf16.msra.mxu1 %v3053_v46  ;;  %1413 = vmatprep.subr.bf16.mxu0 %v3064_v49  ;;  %v3145_v46 = vld [vmem:[#allocation2 + $0x428] ss:$16 sps:$4 sm:$0xff]   ;;  %v3156_v49 = vld [vmem:[#allocation2 + $0x3cc] ss:$16 sps:$4 sm:$0xff]  }
  0x91   :  { %1491 = vmatprep.subr.bf16.mxu1 %v3061_v48  ;;  %v3153_v48 = vld [vmem:[#allocation2 + $0x40c] ss:$16 sps:$4 sm:$0xff]  }
  0x93   :  { %1414 = vmatpush2.bf16.msra.mxu0 %v3062_v52  ;;  %v3154_v52 = vld [vmem:[#allocation2 + $0x3c8] ss:$16 sps:$4 sm:$0xff]  }
  0x94   :  { %1492 = vmatpush2.bf16.msra.mxu1 %v3059_v50  ;;  %1415 = vmatprep.subr.bf16.mxu0 %v3070_v54  ;;  %v3151_v50 = vld [vmem:[#allocation2 + $0x408] ss:$16 sps:$4 sm:$0xff]   ;;  %v3162_v54 = vld [vmem:[#allocation2 + $0x3ac] ss:$16 sps:$4 sm:$0xff]  }
  0x95   :  { %1493 = vmatprep.subr.bf16.mxu1 %v3067_v53  ;;  %v3159_v53 = vld [vmem:[#allocation2 + $0x5ec] ss:$16 sps:$4 sm:$0xff]  }
  0x97   :  { %1416 = vmatpush2.bf16.msra.mxu0 %v3068_v56  ;;  %v3160_v56 = vld [vmem:[#allocation2 + $0x3a8] ss:$16 sps:$4 sm:$0xff]  }
  0x98   :  { %1494 = vmatpush2.bf16.msra.mxu1 %v3065_v55  ;;  %1417 = vmatprep.subr.bf16.mxu0 %v3076_v58  ;;  %v3157_v55 = vld [vmem:[#allocation2 + $0x5e8] ss:$16 sps:$4 sm:$0xff]   ;;  %v3168_v58 = vld [vmem:[#allocation2 + $0x38c] ss:$16 sps:$4 sm:$0xff]  }
  0x99   :  { %1495 = vmatprep.subr.bf16.mxu1 %v3073_v57  ;;  %v3165_v57 = vld [vmem:[#allocation2 + $0x5cc] ss:$16 sps:$4 sm:$0xff]  }
  0x9b   :  { %1418 = vmatpush2.bf16.msra.mxu0 %v3074_v60  ;;  %v3166_v60 = vld [vmem:[#allocation2 + $0x388] ss:$16 sps:$4 sm:$0xff]  }
  0x9c   :  { %1496 = vmatpush2.bf16.msra.mxu1 %v3071_v59  ;;  %1419 = vmatprep.subr.bf16.mxu0 %v3082_v62  ;;  %v3163_v59 = vld [vmem:[#allocation2 + $0x5c8] ss:$16 sps:$4 sm:$0xff]   ;;  %v3174_v62 = vld [vmem:[#allocation2 + $0x36c] ss:$16 sps:$4 sm:$0xff]  }
  0x9d   :  { %1497 = vmatprep.subr.bf16.mxu1 %v3079_v61  ;;  %v3171_v61 = vld [vmem:[#allocation2 + $0x5ac] ss:$16 sps:$4 sm:$0xff]  }
  0x9f   :  { %1420 = vmatpush2.bf16.msra.mxu0 %v3080_v0  ;;  %v3172_v0 = vld [vmem:[#allocation2 + $0x368] ss:$16 sps:$4 sm:$0xff]  }
  0xa0   :  { %1498 = vmatpush2.bf16.msra.mxu1 %v3077_v63  ;;  %1421 = vmatprep.subr.bf16.mxu0 %v3088_v2  ;;  %v3169_v63 = vld [vmem:[#allocation2 + $0x5a8] ss:$16 sps:$4 sm:$0xff]   ;;  %v3180_v2 = vld [vmem:[#allocation2 + $0x34c] ss:$16 sps:$4 sm:$0xff]  }
  0xa1   :  { %1499 = vmatprep.subr.bf16.mxu1 %v3085_v1  ;;  %v3177_v1 = vld [vmem:[#allocation2 + $0x58c] ss:$16 sps:$4 sm:$0xff]  }
  0xa3   :  { %1422 = vmatpush2.bf16.msra.mxu0 %v3086_v4  ;;  %v3178_v4 = vld [vmem:[#allocation2 + $0x348] ss:$16 sps:$4 sm:$0xff]  }
  0xa4   :  { %1500 = vmatpush2.bf16.msra.mxu1 %v3083_v3  ;;  %1423 = vmatprep.subr.bf16.mxu0 %v3094_v8  ;;  %v3175_v3 = vld [vmem:[#allocation2 + $0x588] ss:$16 sps:$4 sm:$0xff]   ;;  %v3186_v8 = vld [vmem:[#allocation2 + $0x32c] ss:$16 sps:$4 sm:$0xff]  }
  0xa5   :  { %1501 = vmatprep.subr.bf16.mxu1 %v3091_v5  ;;  %v3183_v5 = vld [vmem:[#allocation2 + $0x56c] ss:$16 sps:$4 sm:$0xff]  }
  0xa7   :  { %1424 = vmatpush2.bf16.msra.mxu0 %v3092_v10  ;;  %v3184_v10 = vld [vmem:[#allocation2 + $0x328] ss:$16 sps:$4 sm:$0xff]  }
  0xa8   :  { %1502 = vmatpush2.bf16.msra.mxu1 %v3089_v9  ;;  %1516 = vmatprep.subr.bf16.mxu0 %v3102_v12  ;;  %v3181_v9 = vld [vmem:[#allocation2 + $0x568] ss:$16 sps:$4 sm:$0xff]   ;;  %v3192_v12 = vld [vmem:[#allocation2 + $0x30c] ss:$16 sps:$4 sm:$0xff]  }
  0xa9   :  { %1503 = vmatprep.subr.bf16.mxu1 %v3099_v11  ;;  %v3189_v11 = vld [vmem:[#allocation2 + $0x54c] ss:$16 sps:$4 sm:$0xff]  }
  0xaa   :  { %1426 = vmatmul.mubr.bf16.vlgmr.msra.gmra.mxu0 %v3533_v14 }
  0xab   :  { %1517 = vmatpush1.bf16.msra.mxu0 %v3100_v16  ;;  %1548 = vmatprep.mubr.bf16.mxu0 %v3502_v51  ;;  %v3124_v51 = vld [vmem:[#allocation2 + $0x268] ss:$16 sps:$4 sm:$0xff]  }
  0xac   :  { %1504 = vmatpush2.bf16.msra.mxu1 %v3097_v15  ;;  %1518 = vmatprep.subr.bf16.mxu0 %v3108_v19  ;;  %v3187_v15 = vld [vmem:[#allocation2 + $0x548] ss:$16 sps:$4 sm:$0xff]   ;;  %v3204_v19 = vld [vmem:[#allocation5 + $0x74] ss:$8 sps:$4 sm:$0xff]  }
  0xad   :  { %1505 = vmatprep.subr.bf16.mxu1 %v3105_v18  ;;  %v3190_v16 = vld [vmem:[#allocation2 + $0x308] ss:$16 sps:$4 sm:$0xff]   ;;  %v3195_v18 = vld [vmem:[#allocation2 + $0x52c] ss:$16 sps:$4 sm:$0xff]  }
  0xaf   :  { %1519 = vmatpush1.bf16.msra.mxu0 %v3106_v21  ;;  %v3202_v21 = vld [vmem:[#allocation5 + $0x70] ss:$8 sps:$4 sm:$0xff]  }
  0xb0   :  { %1506 = vmatpush2.bf16.msra.mxu1 %v3103_v20  ;;  %1520 = vmatprep.subr.bf16.mxu0 %v3114_v23  ;;  %v3193_v20 = vld [vmem:[#allocation2 + $0x528] ss:$16 sps:$4 sm:$0xff]   ;;  %v3207_v23 = vld [vmem:[#allocation5 + $0x64] ss:$8 sps:$4 sm:$0xff]  }
  0xb1   :  { %1557 = vmatprep.subr.bf16.mxu1 %v3111_v22  ;;  %v3198_v22 = vld [vmem:[#allocation2 + $0x50c] ss:$16 sps:$4 sm:$0xff]  }
  0xb3   :  { %1508 = vmatmul.mubr.bf16.vlgmr.msra.gmra.mxu1 %v3506_v6  ;;  %1521 = vmatpush1.bf16.msra.mxu0 %v3112_v25  ;;  %v3130_v6 = vld [vmem:[#allocation2 + $0x248] ss:$16 sps:$4 sm:$0xff]  }
  0xb4   :  { %1558 = vmatpush1.bf16.msra.mxu1 %v3109_v24  ;;  %1522 = vmatprep.subr.bf16.mxu0 %v3120_v27  ;;  %v3196_v24 = vld [vmem:[#allocation2 + $0x508] ss:$16 sps:$4 sm:$0xff]   ;;  %v3210_v27 = vld [vmem:[#allocation5 + $0x54] ss:$8 sps:$4 sm:$0xff]  }
  0xb5   :  { %1559 = vmatprep.subr.bf16.mxu1 %v3117_v26  ;;  %1589 = vmatprep.mubr.bf16.mxu1 %v3528_v33  ;;  %v3141_v33 = vld [vmem:[#allocation2 + $0x44c] ss:$16 sps:$4 sm:$0xff]   ;;  %v3205_v25 = vld [vmem:[#allocation5 + $0x60] ss:$8 sps:$4 sm:$0xff]  }
  0xb6   :  { %v3201_v26 = vld [vmem:[#allocation2 + $0x60c] ss:$16 sps:$4 sm:$0xff]  }
  0xb7   :  { %1523 = vmatpush1.bf16.msra.mxu0 %v3118_v29  ;;  %v3208_v29 = vld [vmem:[#allocation5 + $0x50] ss:$8 sps:$4 sm:$0xff]  }
  0xb8   :  { %1560 = vmatpush1.bf16.msra.mxu1 %v3115_v28  ;;  %1524 = vmatprep.subr.bf16.mxu0 %v3126_v31  ;;  %v3199_v28 = vld [vmem:[#allocation2 + $0x608] ss:$16 sps:$4 sm:$0xff]   ;;  %v3216_v31 = vld [vmem:[#allocation5 + $0x34] ss:$8 sps:$4 sm:$0xff]  }
  0xb9   :  { %1561 = vmatprep.subr.bf16.mxu1 %v3123_v30  ;;  %v3213_v30 = vld [vmem:[#allocation5 + $0x44] ss:$8 sps:$4 sm:$0xff]  }
  0xbb   :  { %1525 = vmatpush1.bf16.msra.mxu0 %v3124_v51  ;;  %v3250_v51 = vld [vmem:[#allocation5 + $0x170] ss:$8 sps:$4 sm:$0xff]  }
  0xbc   :  { %1562 = vmatpush1.bf16.msra.mxu1 %v3121_v32  ;;  %1526 = vmatprep.subr.bf16.mxu0 %v3132_v35  ;;  %v3214_v32 = vld [vmem:[#allocation5 + $0x30] ss:$8 sps:$4 sm:$0xff]   ;;  %v3219_v35 = vld [vmem:[#allocation5 + $0x24] ss:$8 sps:$4 sm:$0xff]  }
  0xbd   :  { %1563 = vmatprep.subr.bf16.mxu1 %v3129_v34  ;;  %v3252_v34 = vld [vmem:[#allocation5 + $0x174] ss:$8 sps:$4 sm:$0xff]  }
  0xbf   :  { %1527 = vmatpush1.bf16.msra.mxu0 %v3130_v6  ;;  %v3217_v6 = vld [vmem:[#allocation5 + $0x20] ss:$8 sps:$4 sm:$0xff]  }
  0xc0   :  { %1564 = vmatpush1.bf16.msra.mxu1 %v3127_v36  ;;  %1528 = vmatprep.subr.bf16.mxu0 %v3138_v38  ;;  %v3255_v36 = vld [vmem:[#allocation5 + $0x164] ss:$8 sps:$4 sm:$0xff]   ;;  %v3256_v38 = vld [vmem:[#allocation5 + $0x150] ss:$8 sps:$4 sm:$0xff]  }
  0xc1   :  { %1565 = vmatprep.subr.bf16.mxu1 %v3135_v37  ;;  %v3222_v37 = vld [vmem:[#allocation5 + $0x14] ss:$8 sps:$4 sm:$0xff]  }
  0xc3   :  { %1529 = vmatpush1.bf16.msra.mxu0 %v3136_v40  ;;  %v3261_v40 = vld [vmem:[#allocation5 + $0x144] ss:$8 sps:$4 sm:$0xff]  }
  0xc4   :  { %1566 = vmatpush1.bf16.msra.mxu1 %v3133_v39  ;;  %1530 = vmatprep.subr.bf16.mxu0 %v3144_v41  ;;  %v3220_v39 = vld [vmem:[#allocation5 + $0x10] ss:$8 sps:$4 sm:$0xff]   ;;  %v3259_v41 = vld [vmem:[#allocation5 + $0x140] ss:$8 sps:$4 sm:$0xff]  }
  0xc5   :  { %1567 = vmatprep.subr.bf16.mxu1 %v3141_v33  ;;  %v3225_v33 = vld [vmem:[#allocation5 + $0x4] ss:$8 sps:$4 sm:$0xff]  }
  0xc7   :  { %1531 = vmatpush1.bf16.msra.mxu0 %v3142_v43  ;;  %v3228_v43 = vld [vmem:[#allocation5 + $0xf4] ss:$8 sps:$4 sm:$0xff]  }
  0xc8   :  { %1568 = vmatpush1.bf16.msra.mxu1 %v3139_v42  ;;  %1532 = vmatprep.subr.bf16.mxu0 %v3150_v45  ;;  %v3264_v42 = vld [vmem:[#allocation5 + $0x134] ss:$8 sps:$4 sm:$0xff]   ;;  %v3226_v45 = vld [vmem:[#allocation5 + $0xf0] ss:$8 sps:$4 sm:$0xff]  }
  0xc9   :  { %1569 = vmatprep.subr.bf16.mxu1 %v3147_v44  ;;  %v3262_v44 = vld [vmem:[#allocation5 + $0x130] ss:$8 sps:$4 sm:$0xff]  }
  0xcb   :  { %1533 = vmatpush2.bf16.msra.mxu0 %v3148_v47  ;;  %v3231_v47 = vld [vmem:[#allocation5 + $0xe4] ss:$8 sps:$4 sm:$0xff]  }
  0xcc   :  { %1570 = vmatpush1.bf16.msra.mxu1 %v3145_v46  ;;  %1534 = vmatprep.subr.bf16.mxu0 %v3156_v49  ;;  %v3267_v46 = vld [vmem:[#allocation5 + $0x124] ss:$8 sps:$4 sm:$0xff]   ;;  %v3229_v49 = vld [vmem:[#allocation5 + $0xe0] ss:$8 sps:$4 sm:$0xff]  }
  0xcd   :  { %1571 = vmatprep.subr.bf16.mxu1 %v3153_v48  ;;  %v3265_v48 = vld [vmem:[#allocation5 + $0x120] ss:$8 sps:$4 sm:$0xff]  }
  0xcf   :  { %1535 = vmatpush2.bf16.msra.mxu0 %v3154_v52  ;;  %v3234_v52 = vld [vmem:[#allocation5 + $0xd4] ss:$8 sps:$4 sm:$0xff]  }
  0xd0   :  { %1572 = vmatpush1.bf16.msra.mxu1 %v3151_v50  ;;  %1536 = vmatprep.subr.bf16.mxu0 %v3162_v54  ;;  %v3270_v50 = vld [vmem:[#allocation5 + $0x114] ss:$8 sps:$4 sm:$0xff]   ;;  %v3232_v54 = vld [vmem:[#allocation5 + $0xd0] ss:$8 sps:$4 sm:$0xff]  }
  0xd1   :  { %1573 = vmatprep.subr.bf16.mxu1 %v3159_v53  ;;  %v3268_v53 = vld [vmem:[#allocation5 + $0x110] ss:$8 sps:$4 sm:$0xff]  }
  0xd3   :  { %1537 = vmatpush2.bf16.msra.mxu0 %v3160_v56  ;;  %v3237_v56 = vld [vmem:[#allocation5 + $0xc4] ss:$8 sps:$4 sm:$0xff]  }
  0xd4   :  { %1574 = vmatpush2.bf16.msra.mxu1 %v3157_v55  ;;  %1538 = vmatprep.subr.bf16.mxu0 %v3168_v58  ;;  %v3273_v55 = vld [vmem:[#allocation5 + $0x104] ss:$8 sps:$4 sm:$0xff]   ;;  %v3235_v58 = vld [vmem:[#allocation5 + $0xc0] ss:$8 sps:$4 sm:$0xff]  }
  0xd5   :  { %1575 = vmatprep.subr.bf16.mxu1 %v3165_v57  ;;  %v3271_v57 = vld [vmem:[#allocation5 + $0x100] ss:$8 sps:$4 sm:$0xff]  }
  0xd7   :  { %1539 = vmatpush2.bf16.msra.mxu0 %v3166_v60  ;;  %v3240_v60 = vld [vmem:[#allocation5 + $0xb4] ss:$8 sps:$4 sm:$0xff]  }
  0xd8   :  { %1576 = vmatpush2.bf16.msra.mxu1 %v3163_v59  ;;  %1540 = vmatprep.subr.bf16.mxu0 %v3174_v62  ;;  %v3276_v59 = vld [vmem:[#allocation5 + $0x1f4] ss:$8 sps:$4 sm:$0xff]   ;;  %v3238_v62 = vld [vmem:[#allocation5 + $0xb0] ss:$8 sps:$4 sm:$0xff]  }
  0xd9   :  { %1577 = vmatprep.subr.bf16.mxu1 %v3171_v61  ;;  %v3274_v61 = vld [vmem:[#allocation5 + $0x1f0] ss:$8 sps:$4 sm:$0xff]  }
  0xdb   :  { %1541 = vmatpush2.bf16.msra.mxu0 %v3172_v0  ;;  %v3243_v0 = vld [vmem:[#allocation5 + $0xa4] ss:$8 sps:$4 sm:$0xff]  }
  0xdc   :  { %1578 = vmatpush2.bf16.msra.mxu1 %v3169_v63  ;;  %1542 = vmatprep.subr.bf16.mxu0 %v3180_v2  ;;  %v3279_v63 = vld [vmem:[#allocation5 + $0x1e4] ss:$8 sps:$4 sm:$0xff]   ;;  %v3241_v2 = vld [vmem:[#allocation5 + $0xa0] ss:$8 sps:$4 sm:$0xff]  }
  0xdd   :  { %1579 = vmatprep.subr.bf16.mxu1 %v3177_v1  ;;  %v3277_v1 = vld [vmem:[#allocation5 + $0x1e0] ss:$8 sps:$4 sm:$0xff]  }
  0xdf   :  { %1543 = vmatpush2.bf16.msra.mxu0 %v3178_v4  ;;  %v3244_v4 = vld [vmem:[#allocation5 + $0x90] ss:$8 sps:$4 sm:$0xff]  }
  0xe0   :  { %1580 = vmatpush2.bf16.msra.mxu1 %v3175_v3  ;;  %1544 = vmatprep.subr.bf16.mxu0 %v3186_v8  ;;  %v3246_v3 = vld [vmem:[#allocation5 + $0x94] ss:$8 sps:$4 sm:$0xff]   ;;  %v3247_v8 = vld [vmem:[#allocation5 + $0x80] ss:$8 sps:$4 sm:$0xff]  }
  0xe1   :  { %1581 = vmatprep.subr.bf16.mxu1 %v3183_v5  ;;  %v3249_v5 = vld [vmem:[#allocation5 + $0x84] ss:$8 sps:$4 sm:$0xff]  }
  0xe3   :  { %1545 = vmatpush2.bf16.msra.mxu0 %v3184_v10 }
  0xe4   :  { %1582 = vmatpush2.bf16.msra.mxu1 %v3181_v9  ;;  %1546 = vmatprep.subr.bf16.mxu0 %v3192_v12  ;;  %v3280_v12 = vld [vmem:[#allocation5 + $0x1d0] ss:$8 sps:$4 sm:$0xff]  }
  0xe5   :  { %1583 = vmatprep.subr.bf16.mxu1 %v3189_v11  ;;  %v3282_v11 = vld [vmem:[#allocation5 + $0x1d4] ss:$8 sps:$4 sm:$0xff]  }
  0xe7   :  { %1547 = vmatpush2.bf16.msra.mxu0 %v3190_v16 }
  0xe8   :  { %1584 = vmatpush2.bf16.msra.mxu1 %v3187_v15  ;;  %2043 = vmatprep.subr.bf16.mxu0 %v3204_v19  ;;  %v3285_v19 = vld [vmem:[#allocation5 + $0x1c4] ss:$8 sps:$4 sm:$0xff]  }
  0xe9   :  { %1585 = vmatprep.subr.bf16.mxu1 %v3195_v18  ;;  %v3283_v18 = vld [vmem:[#allocation5 + $0x1c0] ss:$8 sps:$4 sm:$0xff]  }
  0xea   :  { %1549 = vmatmul.mubr.bf16.vlgmr.msra.gmra.mxu0 %v3508_v7  ;;  %v3211_v7 = vld [vmem:[#allocation5 + $0x40] ss:$8 sps:$4 sm:$0xff]  }
  0xeb   :  { %2044 = vmatpush1.bf16.msra.mxu0 %v3202_v21 }
  0xec   :  { %1586 = vmatpush2.bf16.msra.mxu1 %v3193_v20  ;;  %2045 = vmatprep.subr.bf16.mxu0 %v3207_v23 }
  0xed   :  { %1587 = vmatprep.subr.bf16.mxu1 %v3198_v22 }
  0xef   :  { %2046 = vmatpush1.bf16.msra.mxu0 %v3205_v25  ;;  %v3288_v25 = vld [vmem:[#allocation5 + $0x1b4] ss:$8 sps:$4 sm:$0xff]  }
  0xf0   :  { %1588 = vmatpush2.bf16.msra.mxu1 %v3196_v24  ;;  %2047 = vmatprep.subr.bf16.mxu0 %v3210_v27 }
  0xf1   :  { %1612 = vmatprep.subr.bf16.mxu1 %v3201_v26  ;;  %v3286_v26 = vld [vmem:[#allocation5 + $0x1b0] ss:$8 sps:$4 sm:$0xff]  }
  0xf3   :  { %1590 = vmatmul.mubr.bf16.vlgmr.msra.gmra.mxu1 %v3533_v14  ;;  %2048 = vmatpush1.bf16.msra.mxu0 %v3208_v29  ;;  %v3253_v14 = vld [vmem:[#allocation5 + $0x160] ss:$8 sps:$4 sm:$0xff]   ;;  %v3291_v29 = vld [vmem:[#allocation5 + $0x1a4] ss:$8 sps:$4 sm:$0xff]  }
  0xf4   :  { %1613 = vmatpush1.bf16.msra.mxu1 %v3199_v28  ;;  %1630 = vmatprep.mubr.bf16.mxu1 %v3421_v13  ;;  %v3258_v13 = vld [vmem:[#allocation5 + $0x154] ss:$8 sps:$4 sm:$0xff]  }
  0xf5   :  { %2049 = vmatprep.subr.bf16.mxu0 %v3213_v30  ;;  %2084 = vmatprep.subr.bf16.mxu1 %v3252_v34  ;;  %v3289_v30 = vld [vmem:[#allocation5 + $0x1a0] ss:$8 sps:$4 sm:$0xff]  }
  0xf6   :  { %v3295_v34 = vld [vmem:[#allocation5 + $0x180] ss:$8 sps:$4 sm:$0xff]  }
  0xf7   :  { %2050 = vmatpush1.bf16.msra.mxu0 %v3211_v7 }
  0xf8   :  { %2051 = vmatprep.subr.bf16.mxu0 %v3216_v31  ;;  %v3294_v31 = vld [vmem:[#allocation5 + $0x194] ss:$8 sps:$4 sm:$0xff]  }
  0xfb   :  { %2723 = vmatmul.mubr.msk.bf16.vlgmr.msra.gmra.mxu1 %vm1307_vm0, %v3516_v17  ;;  %2052 = vmatpush1.bf16.msra.mxu0 %v3214_v32  ;;  %v3223_v17 = vld [vmem:[#allocation5] ss:$8 sps:$4 sm:$0xff]   ;;  %v3292_v32 = vld [vmem:[#allocation5 + $0x190] ss:$8 sps:$4 sm:$0xff]  }
  0xfc   :  { %2085 = vmatpush1.bf16.msra.mxu1 %v3250_v51  ;;  %2053 = vmatprep.subr.bf16.mxu0 %v3219_v35  ;;  %v3297_v51 = vld [vmem:[#allocation5 + $0x184] ss:$8 sps:$4 sm:$0xff]   ;;  %v283_v35 = vlaneseq }
  0xfd   :  { %2086 = vmatprep.subr.bf16.mxu1 %v3255_v36 }
  0xfe   :  { %v3544_v36 = vshrl.u32 %v283_v35, 7  ;;  %v3307_v35 = vld [vmem:[#allocation7 + $0x18] sm:$0xff]  }
  0xff   :  { %2054 = vmatpush1.bf16.msra.mxu0 %v3217_v6  ;;  %v281_v6 = vld [vmem:[%s3628_s2] sm:$0xf] }
 0x100   :  { %2087 = vmatpush1.bf16.msra.mxu1 %v3253_v14  ;;  %2055 = vmatprep.subr.bf16.mxu0 %v3222_v37  ;;  %v285_v14 = vsub.s32 0, %v3544_v36 }
 0x101   :  { %2088 = vmatprep.subr.bf16.mxu1 %v3258_v13  ;;  %v289_v13 = vsub.s32 1, %v3544_v36 }
 0x102   :  { %v286_v37 = vrot.slane %v281_v6, %v285_v14 }
 0x103   :  { %2056 = vmatpush1.bf16.msra.mxu0 %v3220_v39 }
 0x104   :  { %2089 = vmatpush1.bf16.msra.mxu1 %v3256_v38  ;;  %2057 = vmatprep.subr.bf16.mxu0 %v3225_v33  ;;  %v290_v38 = vrot.slane %v281_v6, %v289_v13 }
 0x105   :  { %2090 = vmatprep.subr.bf16.mxu1 %v3261_v40 }
 0x107   :  { %2058 = vmatpush1.bf16.msra.mxu0 %v3223_v17 }
 0x108   :  { %2091 = vmatpush1.bf16.msra.mxu1 %v3259_v41  ;;  %2059 = vmatprep.subr.bf16.mxu0 %v3228_v43 }
 0x109   :  { %2092 = vmatprep.subr.bf16.mxu1 %v3264_v42 }
 0x10b   :  { %2060 = vmatpush2.bf16.msra.mxu0 %v3226_v45 }
 0x10c   :  { %2093 = vmatpush1.bf16.msra.mxu1 %v3262_v44  ;;  %2061 = vmatprep.subr.bf16.mxu0 %v3231_v47 }
 0x10d   :  { %2094 = vmatprep.subr.bf16.mxu1 %v3267_v46 }
 0x10f   :  { %2062 = vmatpush2.bf16.msra.mxu0 %v3229_v49 }
 0x110   :  { %2095 = vmatpush1.bf16.msra.mxu1 %v3265_v48  ;;  %2063 = vmatprep.subr.bf16.mxu0 %v3234_v52 }
 0x111   :  { %2096 = vmatprep.subr.bf16.mxu1 %v3270_v50 }
 0x113   :  { %2064 = vmatpush2.bf16.msra.mxu0 %v3232_v54 }
 0x114   :  { %2097 = vmatpush1.bf16.msra.mxu1 %v3268_v53  ;;  %2065 = vmatprep.subr.bf16.mxu0 %v3237_v56 }
 0x115   :  { %2098 = vmatprep.subr.bf16.mxu1 %v3273_v55 }
 0x117   :  { %2066 = vmatpush2.bf16.msra.mxu0 %v3235_v58 }
 0x118   :  { %2099 = vmatpush1.bf16.msra.mxu1 %v3271_v57  ;;  %2067 = vmatprep.subr.bf16.mxu0 %v3240_v60  ;;  %v293_v60 = vsub.s32 2, %v3544_v36 }
 0x119   :  { %2100 = vmatprep.subr.bf16.mxu1 %v3276_v59 }
 0x11b   :  { %2068 = vmatpush2.bf16.msra.mxu0 %v3238_v62  ;;  %v297_v62 = vsub.s32 3, %v3544_v36  ;;  %v3320_v36 = vld [vmem:[%s3633_s7 + $0x8] sm:$0xff]  }
 0x11c   :  { %2101 = vmatpush2.bf16.msra.mxu1 %v3274_v61  ;;  %2069 = vmatprep.subr.bf16.mxu0 %v3243_v0  ;;  %v294_v0 = vrot.slane %v281_v6, %v293_v60 }
 0x11d   :  { %2102 = vmatprep.subr.bf16.mxu1 %v3279_v63 }
 0x11f   :  { %2070 = vmatpush2.bf16.msra.mxu0 %v3241_v2  ;;  %v298_v2 = vrot.slane %v281_v6, %v297_v62  ;;  %v3308_v6 = vld [vmem:[#allocation7 + $0x50] sm:$0xff]  }
 0x120   :  { %2103 = vmatpush2.bf16.msra.mxu1 %v3277_v1  ;;  %2071 = vmatprep.subr.bf16.mxu0 %v3246_v3 }
 0x121   :  { %2104 = vmatprep.subr.bf16.mxu1 %v3282_v11 }
 0x123   :  { %2072 = vmatpush2.bf16.msra.mxu0 %v3244_v4 }
 0x124   :  { %2073 = vmatprep.subr.bf16.mxu0 %v3249_v5  ;;  %2105 = vmatpush2.bf16.msra.mxu1 %v3280_v12 }
 0x125   :  { %2106 = vmatprep.subr.bf16.mxu1 %v3285_v19 }
 0x127   :  { %2074 = vmatpush2.bf16.msra.mxu0 %v3247_v8 }
 0x128   :  { %2107 = vmatpush2.bf16.msra.mxu1 %v3283_v18 }
 0x129   :  { %2108 = vmatprep.subr.bf16.mxu1 %v3288_v25 }
 0x12a   :  { %v1345_v9 = vpop.f32.mrf.mxu0 }
 0x12b   :  { %v1386_v10 = vpop.f32.mrf.mxu1  ;;  %v1346_v39 = vadd.f32 %v1345_v9, %v286_v37  ;;  %v3309_v37 = vld [vmem:[#allocation7 + $0x10] sm:$0xff]  }
 0x12c   :  { %v1347_v15 = vpop.f32.mrf.mxu0  ;;  %2109 = vmatpush2.bf16.msra.mxu1 %v3286_v26 }
 0x12d   :  { %v1388_v16 = vpop.f32.mrf.mxu1  ;;  %2110 = vmatprep.subr.bf16.mxu1 %v3291_v29  ;;  %v1348_v40 = vadd.f32 %v1347_v15, %v290_v38  ;;  %v1387_v33 = vadd.f32 %v1386_v10, %v1346_v39  ;;  %v3302_v29 = vld [vmem:[#allocation7 + $0x68] sm:$0xff]  }
 0x12e   :  { %v1349_v21 = vpop.f32.mrf.mxu0  ;;  %v3310_v38 = vld [vmem:[#allocation7 + $0x48] sm:$0xff]  }
 0x12f   :  { %v1390_v20 = vpop.f32.mrf.mxu1  ;;  %v1389_v17 = vadd.f32 %v1388_v16, %v1348_v40  ;;  %v3299_v21 = vld [vmem:[#allocation7 + $0x38] sm:$0xff]   ;;  %v3311_v39 = vld [vmem:[#allocation7 + $0x8] sm:$0xff]   ;;  %v3312_v40 = vld [vmem:[#allocation7 + $0x40] sm:$0xff]  }
 0x130   :  { %v1350_v23 = vpop.f32.mrf.mxu0  ;;  %2111 = vmatpush2.bf16.msra.mxu1 %v3289_v30  ;;  %v3298_v20 = vld [vmem:[#allocation7 + $0x78] sm:$0xff]  }
 0x131   :  { %v1391_v22 = vpop.f32.mrf.mxu1  ;;  %2112 = vmatprep.subr.bf16.mxu1 %v3294_v31  ;;  %2820 = vmatprep.subr.bf16.mxu0 %v3298_v20  ;;  %v3303_v31 = vld [vmem:[#allocation7 + $0x28] sm:$0xff]   ;;  %v2805_v20 = vld [vmem:[%s3634_s8] ss:$0 sm:$0xff] }
 0x132   :  { %v3300_v22 = vld [vmem:[#allocation7 + $0x70] sm:$0xff]  }
 0x133   :  { %v1468_v24 = vpop.f32.mrf.mxu1 }
 0x134   :  { %2113 = vmatpush2.bf16.msra.mxu1 %v3292_v32  ;;  %v3304_v32 = vld [vmem:[#allocation7 + $0x60] sm:$0xff]  }
 0x135   :  { %v1470_v27 = vpop.f32.mrf.mxu1  ;;  %2114 = vmatprep.subr.bf16.mxu1 %v3297_v51  ;;  %v3305_v51 = vld [vmem:[#allocation7 + $0x20] sm:$0xff]  }
 0x137   :  { %v1472_v28 = vpop.f32.mrf.mxu1 }
 0x138   :  { %2115 = vmatpush2.bf16.msra.mxu1 %v3295_v34  ;;  %v3306_v34 = vld [vmem:[#allocation7 + $0x58] sm:$0xff]  }
 0x139   :  { %v1473_v7 = vpop.f32.mrf.mxu1 }
 0x16a   :  { %v1427_v41 = vpop.f32.mrf.mxu0 }
 0x16b   :  { %v1428_v42 = vadd.f32 %v1427_v41, %v1387_v33  ;;  %v3313_v33 = vld [vmem:[#allocation7] sm:$0xff]   ;;  %v3314_v41 = vld [vmem:[%s3633_s7 + $0x38] sm:$0xff]  }
 0x16c   :  { %v1429_v43 = vpop.f32.mrf.mxu0 }
 0x16d   :  { %v1469_v44 = vadd.f32 %v1468_v24, %v1428_v42  ;;  %v1430_v45 = vadd.f32 %v1429_v43, %v1389_v17  ;;  %v3422_v17 = vmov 0.0   ;;  %v3315_v42 = vld [vmem:[%s3633_s7 + $0x30] sm:$0xff]   ;;  %v3316_v43 = vld [vmem:[%s3633_s7 + $0x28] sm:$0xff]  }
 0x16e   :  { %v1431_v46 = vpop.f32.mrf.mxu0  ;;  %2856 = vmatprep.subr.bf16.mxu1 %v3422_v17 }
 0x16f   :  { %v1471_v47 = vadd.f32 %v1470_v27, %v1430_v45  ;;  %v1639_v48 = vmax.f32 %v1469_v44, 0.0  ;;  %v3301_v27 = vld [vmem:[#allocation7 + $0x30] sm:$0xff]   ;;  %v3317_v44 = vld [vmem:[%s3633_s7 + $0x20] sm:$0xff]   ;;  %v3318_v45 = vld [vmem:[%s3633_s7 + $0x18] sm:$0xff]  }
 0x170   :  { %v1432_v49 = vpop.f32.mrf.mxu0 }
 0x171   :  { %v1640_v50 = vmax.f32 %v1471_v47, 0.0  ;;  %v1643_v54 = vpack.c.bf16 %v1639_v48, %v1639_v48 }
 0x173   :  { %v1509_v52 = vpop.f32.mrf.mxu1  ;;  %v1644_v53 = vpack.c.bf16 %v1640_v50, %v1640_v50  ;;  %v1711_v50 = vld [vmem:[%s3630_s4] sm:$0x3] }
 0x174   :  { %v1510_v4 = vadd.f32 %v1509_v52, %v294_v0  ;;  %v1716_v52 = vrot.slane %v1711_v50, %v285_v14  ;;  %v3319_v14 = vld [vmem:[%s3633_s7 + $0x10] sm:$0xff]  }
 0x175   :  { %v1511_v55 = vpop.f32.mrf.mxu1  ;;  %2075 = vmatprep.mubr.bf16.mxu0 %v1644_v53  ;;  %v1720_v53 = vrot.slane %v1711_v50, %v289_v13  ;;  %v3321_v13 = vld [vmem:[%s3633_s7] sm:$0xff]  }
 0x176   :  { %2076 = vmatmul.mubr.bf16.vlgmr.msra.gmra.mxu0 %v1643_v54  ;;  %v1512_v8 = vadd.f32 %v1511_v55, %v298_v2  ;;  %v3322_v2 = vld [vmem:[%s3635_s9 + $0x18] sm:$0xff]  }
 0x177   :  { %v1513_v56 = vpop.f32.mrf.mxu1  ;;  %2821 = vmatpush3.bf16.msra.mxu0 %v3299_v21 }
 0x178   :  { %2822 = vmatprep.subr.bf16.mxu0 %v3300_v22 }
 0x179   :  { %v1514_v57 = vpop.f32.mrf.mxu1 }
 0x17b   :  { %2823 = vmatpush3.bf16.msra.mxu0 %v3301_v27 }
 0x17c   :  { %2824 = vmatprep.subr.bf16.mxu0 %v3302_v29 }
 0x17f   :  { %2825 = vmatpush3.bf16.msra.mxu0 %v3303_v31 }
 0x180   :  { %2826 = vmatprep.subr.bf16.mxu0 %v3304_v32 }
 0x183   :  { %2827 = vmatpush3.bf16.msra.mxu0 %v3305_v51 }
 0x184   :  { %2828 = vmatprep.subr.bf16.mxu0 %v3306_v34 }
 0x187   :  { %2829 = vmatpush3.bf16.msra.mxu0 %v3307_v35 }
 0x188   :  { %2830 = vmatprep.subr.bf16.mxu0 %v3308_v6 }
 0x18b   :  { %2831 = vmatpush3.bf16.msra.mxu0 %v3309_v37 }
 0x18c   :  { %2832 = vmatprep.subr.bf16.mxu0 %v3310_v38 }
 0x18f   :  { %2833 = vmatpush3.bf16.msra.mxu0 %v3311_v39 }
 0x190   :  { %2834 = vmatprep.subr.bf16.mxu0 %v3312_v40 }
 0x193   :  { %2835 = vmatpush3.bf16.msra.mxu0 %v3313_v33 }
 0x194   :  { %2876 = vmatprep.subr.bf16.mxu0 %v3422_v17 }
 0x1aa   :  { %v1550_v58 = vpop.f32.mrf.mxu0 }
 0x1ab   :  { %v1551_v9 = vadd.f32 %v1550_v58, %v1510_v4 }
 0x1ac   :  { %v1552_v59 = vpop.f32.mrf.mxu0 }
 0x1ad   :  { %v1553_v11 = vadd.f32 %v1552_v59, %v1512_v8 }
 0x1ae   :  { %v1554_v61 = vpop.f32.mrf.mxu0 }
 0x1b0   :  { %v1555_v63 = vpop.f32.mrf.mxu0 }
 0x1b3   :  { %v1591_v1 = vpop.f32.mrf.mxu1 }
 0x1b4   :  { %v1592_v12 = vadd.f32 %v1591_v1, %v1551_v9 }
 0x1b5   :  { %v1593_v3 = vpop.f32.mrf.mxu1 }
 0x1b6   :  { %v1594_v16 = vadd.f32 %v1593_v3, %v1553_v11  ;;  %v3323_v3 = vld [vmem:[%s3635_s9 + $0x10] sm:$0xff]  }
 0x1b7   :  { %v1595_v5 = vpop.f32.mrf.mxu1 }
 0x1b8   :  { %v2788_v5 = vld [vmem:[%s3632_s6] ss:$0 sm:$0xff] }
 0x1b9   :  { %v1596_v10 = vpop.f32.mrf.mxu1 }
 0x1bb   :  { %v1632_v15 = vpop.f32.mrf.mxu1 }
 0x1bc   :  { %v1633_v18 = vadd.f32 %v1632_v15, %v1592_v12 }
 0x1bd   :  { %v1634_v19 = vpop.f32.mrf.mxu1 }
 0x1be   :  { %v1635_v23 = vadd.f32 %v1634_v19, %v1594_v16  ;;  %v1641_v24 = vmax.f32 %v1633_v18, 0.0  ;;  %v3324_v18 = vld [vmem:[%s3635_s9 + $0x8] sm:$0xff]   ;;  %v3325_v19 = vld [vmem:[%s3635_s9] sm:$0xff]   ;;  %s2509_s9 = sshll.u32 %s3424_s29, 4  ;;  %s2510_s9 = int_to_ptr.vmem [resolvable:$true] %s2509_s9 }
 0x1bf   :  { %v1636_v25 = vpop.f32.mrf.mxu1  ;;  %s3386_s8 = scalar_lea.vmem %s2510_s9, 128  ;;  %p3391_p2 = scmp.lt.s32.totalorder %s2510_s9, %s2510_s9 }
 0x1c0   :  { %v1642_v26 = vmax.f32 %v1635_v23, 0.0  ;;  %v1645_v7 = vpack.c.bf16 %v1641_v24, %v1641_v24  ;;  %p3387_p1 = scmp.ne.s32.totalorder %s2510_s9, %s3386_s8  ;;  %p3392_p3 = scmp.lt.s32.totalorder %s3386_s8, %s3386_s8 }
 0x1c1   :  { %v1637_v28 = vpop.f32.mrf.mxu1 }
 0x1c2   :  { %v1646_v30 = vpack.c.bf16 %v1642_v26, %v1642_v26  ;;  %v2814_v28 = vld [vmem:[%s3636_s10] ss:$0 sm:$0xff]  ;;  %p3393_p4 = por %p3392_p3, %p3391_p2 }
 0x1c4   :  { %2116 = vmatprep.mubr.bf16.mxu1 %v1646_v30  ;;  %p3394_p5 = pnand %p3393_p4, %p3387_p1 }
 0x1c5   :  { %2117 = vmatmul.mubr.bf16.vlgmr.msra.gmra.mxu1 %v1645_v7 }
 0x1c6   :  { %2857 = vmatpush3.bf16.msra.mxu1 %v3314_v41  ;;  %2872 = vmatprep.mubr.msk.bf16.mxu1 %vm3423_vm1, %v3422_v17 }
 0x1c7   :  { %2858 = vmatprep.subr.bf16.mxu1 %v3422_v17 }
 0x1ca   :  { %2859 = vmatpush3.bf16.msra.mxu1 %v3315_v42 }
 0x1cb   :  { %2860 = vmatprep.subr.bf16.mxu1 %v3422_v17 }
 0x1ce   :  { %2861 = vmatpush3.bf16.msra.mxu1 %v3316_v43 }
 0x1cf   :  { %2862 = vmatprep.subr.bf16.mxu1 %v3422_v17 }
 0x1d2   :  { %2863 = vmatpush3.bf16.msra.mxu1 %v3317_v44 }
 0x1d3   :  { %2864 = vmatprep.subr.bf16.mxu1 %v3422_v17 }
 0x1d6   :  { %2865 = vmatpush3.bf16.msra.mxu1 %v3318_v45 }
 0x1d7   :  { %2866 = vmatprep.subr.bf16.mxu1 %v3422_v17 }
 0x1da   :  { %2867 = vmatpush3.bf16.msra.mxu1 %v3319_v14 }
 0x1db   :  { %2868 = vmatprep.subr.bf16.mxu1 %v3422_v17 }
 0x1de   :  { %2869 = vmatpush3.bf16.msra.mxu1 %v3320_v36 }
 0x1df   :  { %2870 = vmatprep.subr.bf16.mxu1 %v3422_v17 }
 0x1e2   :  { %2871 = vmatpush3.bf16.msra.mxu1 %v3321_v13 }
 0x236   :  { %v2077_v46 = vpop.f32.mrf.mxu0 }
 0x237   :  { %v2078_v54 = vadd.f32 %v2077_v46, %v1716_v52 }
 0x238   :  { %v2079_v47 = vpop.f32.mrf.mxu0 }
 0x239   :  { %v2080_v56 = vadd.f32 %v2079_v47, %v1720_v53 }
 0x23a   :  { %v2081_v48 = vpop.f32.mrf.mxu0 }
 0x23c   :  { %v2082_v49 = vpop.f32.mrf.mxu0 }
 0x285   :  { %v2118_v55 = vpop.f32.mrf.mxu1 }
 0x286   :  { %v2119_v57 = vadd.f32 %v2118_v55, %v2078_v54 }
 0x287   :  { %v2120_v58 = vpop.f32.mrf.mxu1 }
 0x288   :  { %v2121_v59 = vadd.f32 %v2120_v58, %v2080_v56  ;;  %v2125_v60 = vmax.f32 %v2119_v57, 0.0 }
 0x289   :  { %v2122_v61 = vpop.f32.mrf.mxu1 }
 0x28a   :  { %v2126_v62 = vmax.f32 %v2121_v59, 0.0  ;;  %v2127_v1 = vpack.c.bf16 %v2125_v60, %v2125_v60 }
 0x28b   :  { %v2123_v63 = vpop.f32.mrf.mxu1 }
 0x28c   :  { %v2128_v0 = vpack.c.bf16 %v2126_v62, %v2126_v62 }
 0x28e   :  { %2296 = vmatprep.mubr.bf16.mxu0 %v2128_v0 }
 0x28f   :  { %2297 = vmatmul.mubr.bf16.vlgmr.msra.gmra.mxu0 %v2127_v1 }
 0x290   :  { %2884 = vmatprep.mubr.msk.bf16.mxu0 %vm3423_vm1, %v3422_v17  ;;  %2877 = vmatpush3.bf16.msra.mxu0 %v3322_v2 }
 0x291   :  { %2878 = vmatprep.subr.bf16.mxu0 %v3422_v17 }
 0x294   :  { %2879 = vmatpush3.bf16.msra.mxu0 %v3323_v3 }
 0x295   :  { %2880 = vmatprep.subr.bf16.mxu0 %v3422_v17 }
 0x298   :  { %2881 = vmatpush3.bf16.msra.mxu0 %v3324_v18 }
 0x299   :  { %2882 = vmatprep.subr.bf16.mxu0 %v3422_v17 }
 0x29c   :  { %2883 = vmatpush3.bf16.msra.mxu0 %v3325_v19 }
 0x34f   :  { %v2836_v4 = vpop.f32.mrf.mxu0 }
 0x351   :  { %v2837_v8 = vpop.f32.mrf.mxu0 }
 0x352   :  { %v2838_v9 = vadd.f32 %v2837_v8, %v2836_v4 }
 0x353   :  { %v2839_v10 = vpop.f32.mrf.mxu0 }
 0x354   :  { %v2299_v11 = vadd.f32 %v2838_v9, %v2788_v5 }
 0x355   :  { %v2840_v12 = vpop.f32.mrf.mxu0 }
 0x356   :  { %v2304_v15 = vmax.f32 %v2299_v11, 0.0 }
 0x358   :  { %v2305_v16 = vpack.c.bf16 %v2304_v15, %v2304_v15 }
 0x35a   :  { %2873 = vmatmul.mubr.bf16.vlgmr.msra.gmra.mxu1 %v2305_v16 }
 0x41a   :  { %v2411_v21 = vpop.f32.mrf.mxu1 }
 0x41b   :  { %v2412_v22 = vadd.f32 %v2805_v20, %v2411_v21 }
 0x41c   :  { %v2874_v23 = vpop.f32.mrf.mxu1 }
 0x41d   :  { %v2417_v24 = vmax.f32 %v2412_v22, 0.0 }
 0x41e   :  { %v2414_v25 = vpop.f32.mrf.mxu1 }
 0x41f   :  { %v2418_v26 = vpack.c.bf16 %v2417_v24, %v2417_v24 }
 0x420   :  { %v2875_v27 = vpop.f32.mrf.mxu1 }
 0x421   :  { %2885 = vmatmul.mubr.msk.bf16.vlgmr.msra.gmra.mxu0 %vm2458_vm2, %v2418_v26 }
 0x4e1   :  { %v2496_v29 = vpop.f32.mrf.mxu0 }
 0x4e2   :  { %v2497_v30 = vadd.f32 %v2814_v28, %v2496_v29 }
 0x4e3   :  { %v2886_v7 = vpop.f32.mrf.mxu0 }
 0x4e4   :  { %2502 = vst [vmem:[#allocation8] sm:$0xff] %v2497_v30 }
 0x4e5   :  { %v2499_v31 = vpop.f32.mrf.mxu0 }
 0x4e6   :  { %3397 = shalt.err (!%p3394_p5)
}
 0x4e7   :  { %2512 = dma.vmem_to_hbm [thread:$0]  %s2510_s9, 128, %s3637_s11, [#allocation4]   ;;  %v2887_v32 = vpop.f32.mrf.mxu0 }
 0x4e8   :  { %3410 = dma.done.wait [#allocation4], 128  }
 0x4e9   :  { %3411 = vsyncadd [#allocation4], 4294967168 }
 0x4ea   :  { %2516 = vsyncpa [#allocation3], 1 }
 0x4eb   :  { %2517 = vsyncpa [#allocation6], 1 }
 0x4ec   :  { %2518 = vsyncpa [#allocation4], 1 }

</bundles_post_ra>
